<compile_context>
chip_gen: v7x
topology: tpu7x:2x2x1
jax: 0.10.0
libtpu: 0.0.40
codegen_flags: <defaults>
</compile_context>

<pallas_src>
import functools

import jax
import jax.numpy as jnp
import numpy as np
from jax.experimental import pallas as pl
from jax.experimental.pallas import tpu as pltpu

EPS = 1e-5                      # PyTorch BatchNorm2d default
MATMUL_DTYPE = jnp.bfloat16     # MXU operand dtype (f32 accumulation everywhere)


# ---------------------------------------------------------------------------
# packing helpers (one-time, hoisted out of the forward path)
# ---------------------------------------------------------------------------
def _tile_row(v, reps):
    """Per-channel vector -> (1, reps*C) row matching the (w, c) lane order."""
    return jnp.tile(v.astype(jnp.float32), reps).reshape(1, -1)


def _fold_bn(mean, var, gamma, beta):
    scale = gamma / jnp.sqrt(var + EPS)
    shift = beta - mean * scale
    return scale, shift


def _blockdiag_1x1(w_oi11, Wo):
    """(Cout, Cin, 1, 1) torch weight -> (Wo*Cin, Wo*Cout) block-diagonal matrix."""
    w = jnp.transpose(w_oi11[:, :, 0, 0], (1, 0))              # (Cin, Cout)
    return jnp.kron(jnp.eye(Wo, dtype=jnp.float32), w).astype(MATMUL_DTYPE)


def _banded_3x3(w_oihw, Wo):
    """(Cout, Cin, 3, 3) torch weight -> (3, Wo*Cin, Wo*Cout) banded row matrices.

    Row matrix ky encodes all 3 kx taps (and the W zero-padding) of kernel row ky:
      band[ky][wi*Cin+ci, wo*Cout+co] = w[co, ci, ky, wi-wo+1]  for wi-wo+1 in {0,1,2}.
    """
    bands = []
    for ky in range(3):
        acc = 0
        for kx in range(3):
            acc = acc + jnp.kron(jnp.eye(Wo, k=1 - kx, dtype=jnp.float32),
                                 jnp.transpose(w_oihw[:, :, ky, kx], (1, 0)))
        bands.append(acc)
    return jnp.stack(bands, axis=0).astype(MATMUL_DTYPE)


def pack_block_params(params, Wo, has_proj):
    """One-time repacking of the block parameters into lane-dense layouts.

    Hoisted out of the per-forward path (per review): the kron block-diagonal /
    banded construction runs once per (params, Wo), not on every forward call.
    """
    Cmid = params["w1"].shape[0]
    packed = {
        "g1": params["g1"].astype(jnp.float32),
        "be1": params["be1"].astype(jnp.float32),
        "w1": _blockdiag_1x1(params["w1"], Wo),
        "b1": _tile_row(params["b1"], Wo),
        "g2": _tile_row(params["g2"], Wo),
        "be2": _tile_row(params["be2"], Wo),
        "w2": _banded_3x3(params["w2"], Wo),
        "b2": _tile_row(params["b2"], Wo),
        "g3": _tile_row(params["g3"], Wo),
        "be3": _tile_row(params["be3"], Wo),
        "w3": _blockdiag_1x1(params["w3"], Wo),
        # 0/1 group-sum matrix kron(ones(Wo,Wo), eye(Cmid)): right-multiplying a
        # (rows, Wo*Cmid) tensor by it sums the Wo same-channel lane groups and
        # broadcasts the per-channel total back to every w position.
        "p": jnp.kron(jnp.ones((Wo, Wo), jnp.float32),
                      jnp.eye(Cmid, dtype=jnp.float32)),
    }
    b3 = _tile_row(params["b3"], Wo)
    if has_proj:
        packed["wsc"] = _blockdiag_1x1(params["wsc"], Wo)
        b3 = b3 + _tile_row(params["bsc"], Wo)       # combine residual + shortcut bias
    packed["b3"] = b3
    return packed


def _full_spec(a):
    """Whole-array block (single grid step keeps everything resident in VMEM)."""
    return pl.BlockSpec(tuple(a.shape), lambda i, _n=a.ndim: (0,) * _n)


# ---------------------------------------------------------------------------
# in-kernel math (traced inside the fused kernel body)
# ---------------------------------------------------------------------------
def _bn_rows(y, p, gamma_row, beta_row, inv_count):
    """Train-mode BN scale/shift rows from batch stats of y (rows = N*Ho samples,
    lanes = (w, c) pairs).  The 0/1 matrix p sums over the Wo same-channel lane
    groups and broadcasts back; the row reduction finishes the (N, Ho, Wo) sum."""
    mean = jnp.sum(jnp.dot(y, p, preferred_element_type=jnp.float32),
                   axis=0, keepdims=True) * inv_count
    msq = jnp.sum(jnp.dot(y * y, p, preferred_element_type=jnp.float32),
                  axis=0, keepdims=True) * inv_count
    # Single-pass E[y^2]-E[y]^2 (biased) variance, clamped at 0 (see review note).
    var = jnp.maximum(msq - mean * mean, 0.0)
    scale = gamma_row * jax.lax.rsqrt(var + EPS)
    shift = beta_row - mean * scale
    return scale, shift


def _residual_a3(xs, sc1, sh1, w1, b1, g2, be2, band0, band1, band2, b2,
                 g3, be3, p, s_up, s_dn, inv_count):
    """Residual branch up to a3 = ReLU(BN3(Conv3x3(ReLU(BN2(Conv1x1(ReLU(BN1(x))))))))."""
    # stage 1: BN1 -> ReLU -> 1x1 conv (block-diagonal matmul over (w, c) lanes)
    a1 = jnp.maximum(xs * sc1 + sh1, 0.0)
    y1 = jnp.dot(a1.astype(MATMUL_DTYPE), w1,
                 preferred_element_type=jnp.float32) + b1
    # BN2: in-register batch stats (whole batch resident in this single grid step)
    sc2, sh2 = _bn_rows(y1, p, g2, be2, inv_count)
    a2 = jnp.maximum(y1 * sc2 + sh2, 0.0)
    a2b = a2.astype(MATMUL_DTYPE)
    # stage 2: 3x3 conv (pad=1, stride=1) as 3 banded-row matmuls.  The +-1 H taps
    # come from left-multiplying with boundary-aware 0/1 row-shift matrices: pure MXU
    # work, no scratch round trip / misaligned sublane reloads; accumulator is
    # initialized from the center-tap dot (no zero fill).
    y2 = jnp.dot(a2b, band1, preferred_element_type=jnp.float32)      # ky = 1 (center)
    t0 = jnp.dot(a2b, band0, preferred_element_type=jnp.float32)      # ky = 0 (row above)
    t2 = jnp.dot(a2b, band2, preferred_element_type=jnp.float32)      # ky = 2 (row below)
    y2 = y2 + jnp.dot(s_up, t0, preferred_element_type=jnp.float32)
    y2 = y2 + jnp.dot(s_dn, t2, preferred_element_type=jnp.float32)
    y2 = y2 + b2
    # BN3
    sc3, sh3 = _bn_rows(y2, p, g3, be3, inv_count)
    return jnp.maximum(y2 * sc3 + sh3, 0.0)


# ---------------------------------------------------------------------------
# fused pallas_call (single grid step, everything VMEM-resident)
# ---------------------------------------------------------------------------
def _fused_block_call(xs2d, sc1_row, sh1_row, packed, *, Ho, Wo, has_proj):
    M, _ = xs2d.shape                      # M = N*Ho
    N = M // Ho
    NOUT = packed["b3"].shape[1]           # Wo * Cexp
    inv_count = 1.0 / float(N * Ho * Wo)   # BN2/BN3 element count per channel

    # Boundary-aware +-1 row-shift matrices for the 3x3 conv's H taps.  Built with
    # numpy at trace time (static shapes) -> embedded constants, exact 0/1 entries.
    r = np.arange(M)
    h = r % Ho
    s_up = jnp.asarray(((r[:, None] - 1 == r[None, :]) &
                        (h[:, None] != 0)).astype(np.float32))
    s_dn = jnp.asarray(((r[:, None] + 1 == r[None, :]) &
                        (h[:, None] != Ho - 1)).astype(np.float32))

    common_args = (xs2d, sc1_row, sh1_row,
                   packed["w1"], packed["b1"], packed["g2"], packed["be2"],
                   packed["w2"], packed["b2"], packed["g3"], packed["be3"],
                   packed["p"], s_up, s_dn)

    if has_proj:
        # TODO(synk): once both Wo*Cmid and Wo*Cin are 128-lane aligned, stack
        # [w3; wsc] along K and concatenate [a3, xs] in-kernel to fuse these two
        # dots into a single MXU pass.
        def kernel(xs_ref, sc1_ref, sh1_ref, w1_ref, b1_ref, g2_ref, be2_ref,
                   w2_ref, b2_ref, g3_ref, be3_ref, p_ref, su_ref, sd_ref,
                   w3_ref, wsc_ref, b3_ref, o_ref):
            xs = xs_ref[...]
            a3 = _residual_a3(xs, sc1_ref[...], sh1_ref[...], w1_ref[...], b1_ref[...],
                              g2_ref[...], be2_ref[...],
                              w2_ref[0], w2_ref[1], w2_ref[2], b2_ref[...],
                              g3_ref[...], be3_ref[...], p_ref[...],
                              su_ref[...], sd_ref[...], inv_count)
            res = jnp.dot(a3.astype(MATMUL_DTYPE), w3_ref[...],
                          preferred_element_type=jnp.float32)
            sc = jnp.dot(xs.astype(MATMUL_DTYPE), wsc_ref[...],
                         preferred_element_type=jnp.float32)
            o_ref[...] = res + sc + b3_ref[...]          # b3 already includes bsc

        args = common_args + (packed["w3"], packed["wsc"], packed["b3"])
    else:
        def kernel(xs_ref, sc1_ref, sh1_ref, w1_ref, b1_ref, g2_ref, be2_ref,
                   w2_ref, b2_ref, g3_ref, be3_ref, p_ref, su_ref, sd_ref,
                   w3_ref, b3_ref, o_ref):
            xs = xs_ref[...]
            a3 = _residual_a3(xs, sc1_ref[...], sh1_ref[...], w1_ref[...], b1_ref[...],
                              g2_ref[...], be2_ref[...],
                              w2_ref[0], w2_ref[1], w2_ref[2], b2_ref[...],
                              g3_ref[...], be3_ref[...], p_ref[...],
                              su_ref[...], sd_ref[...], inv_count)
            res = jnp.dot(a3.astype(MATMUL_DTYPE), w3_ref[...],
                          preferred_element_type=jnp.float32) + b3_ref[...]
            o_ref[...] = res + xs                        # identity shortcut: exact f32 add

        args = common_args + (packed["w3"], packed["b3"])

    return pl.pallas_call(
        kernel,
        out_shape=jax.ShapeDtypeStruct((M, NOUT), jnp.float32),
        grid=(1,),
        in_specs=[_full_spec(a) for a in args],
        out_specs=pl.BlockSpec((M, NOUT), lambda i: (0, 0)),
        compiler_params=pltpu.CompilerParams(dimension_semantics=("arbitrary",)),
    )(*args)


# ---------------------------------------------------------------------------
# Wrapper reproducing PreActBottleNeck.forward  (NCHW in / NCHW out)
# ---------------------------------------------------------------------------
@functools.partial(jax.jit, static_argnames=("stride",))
def preact_bottleneck_forward(x_nchw, packed, stride):
    x = jnp.transpose(x_nchw, (0, 2, 3, 1)).astype(jnp.float32)     # NCHW -> NHWC
    N, H, W, Cin = x.shape
    Ho = (H - 1) // stride + 1
    Wo = (W - 1) // stride + 1
    NOUT = packed["b3"].shape[1]
    Cexp = NOUT // Wo
    has_proj = "wsc" in packed

    # BN1 train-mode stats over the FULL input (single fused XLA reduce pass).
    m1 = jnp.mean(x, axis=(0, 1, 2))
    v1 = jnp.maximum(jnp.mean(x * x, axis=(0, 1, 2)) - m1 * m1, 0.0)
    sc1, sh1 = _fold_bn(m1, v1, packed["g1"], packed["be1"])

    # BN1/ReLU are elementwise => they commute with spatial subsampling, so the
    # conv1 / shortcut stride is folded once into a lane-dense (N*Ho, Wo*Cin) slab.
    xs2d = x[:, ::stride, ::stride, :].reshape(N * Ho, Wo * Cin)

    out2d = _fused_block_call(xs2d, _tile_row(sc1, Wo), _tile_row(sh1, Wo), packed,
                              Ho=Ho, Wo=Wo, has_proj=has_proj)

    out = out2d.reshape(N, Ho, Wo, Cexp)
    return jnp.transpose(out, (0, 3, 1, 2))                         # NHWC -> NCHW


# ---------------------------------------------------------------------------
# Pure-JAX reference (mirrors the PyTorch module, train-mode BN)
# ---------------------------------------------------------------------------
def preact_bottleneck_reference(x_nchw, params, stride):
    x = jnp.transpose(x_nchw, (0, 2, 3, 1)).astype(jnp.float32)
    Cin = x.shape[-1]
    Cexp = params["w3"].shape[0]

    def bn_relu(v, g, b):
        m = v.mean(axis=(0, 1, 2))
        var = ((v - m) ** 2).mean(axis=(0, 1, 2))
        return jnp.maximum((v - m) / jnp.sqrt(var + EPS) * g + b, 0.0)

    def conv(v, w_oihw, b, s, pad):
        w = jnp.transpose(w_oihw, (2, 3, 1, 0))
        out = jax.lax.conv_general_dilated(
            v, w, (s, s), [(pad, pad), (pad, pad)],
            dimension_numbers=("NHWC", "HWIO", "NHWC"))
        return out + b

    a1 = bn_relu(x, params["g1"], params["be1"])
    y1 = conv(a1, params["w1"], params["b1"], stride, 0)
    a2 = bn_relu(y1, params["g2"], params["be2"])
    y2 = conv(a2, params["w2"], params["b2"], 1, 1)
    a3 = bn_relu(y2, params["g3"], params["be3"])
    res = conv(a3, params["w3"], params["b3"], 1, 0)
    if stride != 1 or Cin != Cexp:
        sc = conv(x, params["wsc"], params["bsc"], stride, 0)
    else:
        sc = x
    return jnp.transpose(res + sc, (0, 3, 1, 2))


# ---------------------------------------------------------------------------
# Deterministic parameter init (shapes per PreActBottleNeck.__init__, expansion=4)
# ---------------------------------------------------------------------------
def init_params(key, Cin, Cmid):
    Cexp = 4 * Cmid
    ks = jax.random.split(key, 14)
    f32 = jnp.float32
    nrm = lambda k, shp, s: s * jax.random.normal(k, shp, f32)
    return {
        "g1": 1.0 + nrm(ks[0], (Cin,), 0.1), "be1": nrm(ks[1], (Cin,), 0.1),
        "w1": nrm(ks[2], (Cmid, Cin, 1, 1), 0.1), "b1": nrm(ks[3], (Cmid,), 0.05),
        "g2": 1.0 + nrm(ks[4], (Cmid,), 0.1), "be2": nrm(ks[5], (Cmid,), 0.1),
        "w2": nrm(ks[6], (Cmid, Cmid, 3, 3), 0.1), "b2": nrm(ks[7], (Cmid,), 0.05),
        "g3": 1.0 + nrm(ks[8], (Cmid,), 0.1), "be3": nrm(ks[9], (Cmid,), 0.1),
        "w3": nrm(ks[10], (Cexp, Cmid, 1, 1), 0.1), "b3": nrm(ks[11], (Cexp,), 0.05),
        "wsc": nrm(ks[12], (Cexp, Cin, 1, 1), 0.1), "bsc": nrm(ks[13], (Cexp,), 0.05),
    }


if __name__ == "__main__":
    key = jax.random.PRNGKey(0)
    # (N, Cin, out_channels(Cmid), H, W, stride):
    #   projection shortcut, strided projection shortcut, identity shortcut.
    configs = [
        (2, 4, 8, 16, 16, 1),
        (2, 4, 8, 16, 16, 2),
        (2, 32, 8, 16, 16, 1),
    ]
    for (N, Cin, Cmid, H, W, stride) in configs:
        key, kx, kp = jax.random.split(key, 3)
        x = jax.random.normal(kx, (N, Cin, H, W), jnp.float32)
        params = init_params(kp, Cin, Cmid)

        Cexp = 4 * Cmid
        has_proj = (stride != 1) or (Cin != Cexp)
        Wo = (W - 1) // stride + 1
        Ho = (H - 1) // stride + 1

        # One-time weight packing (hoisted out of the forward path).
        packed = pack_block_params(params, Wo, has_proj)

        out = jax.block_until_ready(
            preact_bottleneck_forward(x, packed, stride=stride))
        ref = preact_bottleneck_reference(x, params, stride)

        assert out.shape == ref.shape == (N, Cexp, Ho, Wo), (out.shape, ref.shape)
        max_err = float(jnp.max(jnp.abs(out - ref)))
        # bf16 matmul operands (f32 accumulation) -> loose-ish tolerance vs f32 reference.
        assert jnp.allclose(out, ref, rtol=3e-2, atol=3e-2), (stride, Cin, max_err)

    print("KERNEL_OK")
</pallas_src>

<mosaic_0001>
module attributes {stable_mosaic.version = 11 : i64} {
  func.func @kernel(%arg0: i32, %arg1: memref<32x64xf32, #tpu.memory_space<vmem>>, %arg2: memref<1x64xf32, #tpu.memory_space<vmem>>, %arg3: memref<1x64xf32, #tpu.memory_space<vmem>>, %arg4: memref<64x128xbf16, #tpu.memory_space<vmem>>, %arg5: memref<1x128xf32, #tpu.memory_space<vmem>>, %arg6: memref<1x128xf32, #tpu.memory_space<vmem>>, %arg7: memref<1x128xf32, #tpu.memory_space<vmem>>, %arg8: memref<3x128x128xbf16, #tpu.memory_space<vmem>>, %arg9: memref<1x128xf32, #tpu.memory_space<vmem>>, %arg10: memref<1x128xf32, #tpu.memory_space<vmem>>, %arg11: memref<1x128xf32, #tpu.memory_space<vmem>>, %arg12: memref<128x128xf32, #tpu.memory_space<vmem>>, %arg13: memref<32x32xf32, #tpu.memory_space<vmem>>, %arg14: memref<32x32xf32, #tpu.memory_space<vmem>>, %arg15: memref<128x512xbf16, #tpu.memory_space<vmem>>, %arg16: memref<64x512xbf16, #tpu.memory_space<vmem>>, %arg17: memref<1x512xf32, #tpu.memory_space<vmem>>, %arg18: memref<32x512xf32, #tpu.memory_space<vmem>>) attributes {dimension_semantics = [#tpu.dimension_semantics<arbitrary>], iteration_bounds = array<i64: 1>, scalar_prefetch = 0 : i64, scratch_operands = 0 : i64, tpu.core_type = #tpu.core_type<tc>, window_params = [{pipeline_mode = #tpu.pipeline_mode<synchronous>, transform_indices = @transform_0, window_bounds = array<i64: 32, 64>}, {pipeline_mode = #tpu.pipeline_mode<synchronous>, transform_indices = @transform_1, window_bounds = array<i64: 1, 64>}, {pipeline_mode = #tpu.pipeline_mode<synchronous>, transform_indices = @transform_2, window_bounds = array<i64: 1, 64>}, {pipeline_mode = #tpu.pipeline_mode<synchronous>, transform_indices = @transform_3, window_bounds = array<i64: 64, 128>}, {pipeline_mode = #tpu.pipeline_mode<synchronous>, transform_indices = @transform_4, window_bounds = array<i64: 1, 128>}, {pipeline_mode = #tpu.pipeline_mode<synchronous>, transform_indices = @transform_5, window_bounds = array<i64: 1, 128>}, {pipeline_mode = #tpu.pipeline_mode<synchronous>, transform_indices = @transform_6, window_bounds = array<i64: 1, 128>}, {pipeline_mode = #tpu.pipeline_mode<synchronous>, transform_indices = @transform_7, window_bounds = array<i64: 3, 128, 128>}, {pipeline_mode = #tpu.pipeline_mode<synchronous>, transform_indices = @transform_8, window_bounds = array<i64: 1, 128>}, {pipeline_mode = #tpu.pipeline_mode<synchronous>, transform_indices = @transform_9, window_bounds = array<i64: 1, 128>}, {pipeline_mode = #tpu.pipeline_mode<synchronous>, transform_indices = @transform_10, window_bounds = array<i64: 1, 128>}, {pipeline_mode = #tpu.pipeline_mode<synchronous>, transform_indices = @transform_11, window_bounds = array<i64: 128, 128>}, {pipeline_mode = #tpu.pipeline_mode<synchronous>, transform_indices = @transform_12, window_bounds = array<i64: 32, 32>}, {pipeline_mode = #tpu.pipeline_mode<synchronous>, transform_indices = @transform_13, window_bounds = array<i64: 32, 32>}, {pipeline_mode = #tpu.pipeline_mode<synchronous>, transform_indices = @transform_14, window_bounds = array<i64: 128, 512>}, {pipeline_mode = #tpu.pipeline_mode<synchronous>, transform_indices = @transform_15, window_bounds = array<i64: 64, 512>}, {pipeline_mode = #tpu.pipeline_mode<synchronous>, transform_indices = @transform_16, window_bounds = array<i64: 1, 512>}, {pipeline_mode = #tpu.pipeline_mode<synchronous>, transform_indices = @transform_17, window_bounds = array<i64: 32, 512>}]} {
    %c0 = arith.constant 0 : index
    %c0_0 = arith.constant 0 : index
    %0 = vector.load %arg1[%c0, %c0_0] : memref<32x64xf32, #tpu.memory_space<vmem>>, vector<32x64xf32>
    %c0_1 = arith.constant 0 : index
    %c0_2 = arith.constant 0 : index
    %1 = vector.load %arg2[%c0_1, %c0_2] : memref<1x64xf32, #tpu.memory_space<vmem>>, vector<1x64xf32>
    %c0_3 = arith.constant 0 : index
    %c0_4 = arith.constant 0 : index
    %2 = vector.load %arg3[%c0_3, %c0_4] : memref<1x64xf32, #tpu.memory_space<vmem>>, vector<1x64xf32>
    %c0_5 = arith.constant 0 : index
    %c0_6 = arith.constant 0 : index
    %3 = vector.load %arg4[%c0_5, %c0_6] : memref<64x128xbf16, #tpu.memory_space<vmem>>, vector<64x128xbf16>
    %c0_7 = arith.constant 0 : index
    %c0_8 = arith.constant 0 : index
    %4 = vector.load %arg5[%c0_7, %c0_8] : memref<1x128xf32, #tpu.memory_space<vmem>>, vector<1x128xf32>
    %c0_9 = arith.constant 0 : index
    %c0_10 = arith.constant 0 : index
    %5 = vector.load %arg6[%c0_9, %c0_10] : memref<1x128xf32, #tpu.memory_space<vmem>>, vector<1x128xf32>
    %c0_11 = arith.constant 0 : index
    %c0_12 = arith.constant 0 : index
    %6 = vector.load %arg7[%c0_11, %c0_12] : memref<1x128xf32, #tpu.memory_space<vmem>>, vector<1x128xf32>
    %c0_13 = arith.constant 0 : index
    %c0_14 = arith.constant 0 : index
    %c0_15 = arith.constant 0 : index
    %7 = vector.load %arg8[%c0_13, %c0_14, %c0_15] : memref<3x128x128xbf16, #tpu.memory_space<vmem>>, vector<1x128x128xbf16>
    %8 = vector.shape_cast %7 : vector<1x128x128xbf16> to vector<128x128xbf16>
    %c1 = arith.constant 1 : index
    %c0_16 = arith.constant 0 : index
    %c0_17 = arith.constant 0 : index
    %9 = vector.load %arg8[%c1, %c0_16, %c0_17] : memref<3x128x128xbf16, #tpu.memory_space<vmem>>, vector<1x128x128xbf16>
    %10 = vector.shape_cast %9 : vector<1x128x128xbf16> to vector<128x128xbf16>
    %c2 = arith.constant 2 : index
    %c0_18 = arith.constant 0 : index
    %c0_19 = arith.constant 0 : index
    %11 = vector.load %arg8[%c2, %c0_18, %c0_19] : memref<3x128x128xbf16, #tpu.memory_space<vmem>>, vector<1x128x128xbf16>
    %12 = vector.shape_cast %11 : vector<1x128x128xbf16> to vector<128x128xbf16>
    %c0_20 = arith.constant 0 : index
    %c0_21 = arith.constant 0 : index
    %13 = vector.load %arg9[%c0_20, %c0_21] : memref<1x128xf32, #tpu.memory_space<vmem>>, vector<1x128xf32>
    %c0_22 = arith.constant 0 : index
    %c0_23 = arith.constant 0 : index
    %14 = vector.load %arg10[%c0_22, %c0_23] : memref<1x128xf32, #tpu.memory_space<vmem>>, vector<1x128xf32>
    %c0_24 = arith.constant 0 : index
    %c0_25 = arith.constant 0 : index
    %15 = vector.load %arg11[%c0_24, %c0_25] : memref<1x128xf32, #tpu.memory_space<vmem>>, vector<1x128xf32>
    %c0_26 = arith.constant 0 : index
    %c0_27 = arith.constant 0 : index
    %16 = vector.load %arg12[%c0_26, %c0_27] : memref<128x128xf32, #tpu.memory_space<vmem>>, vector<128x128xf32>
    %c0_28 = arith.constant 0 : index
    %c0_29 = arith.constant 0 : index
    %17 = vector.load %arg13[%c0_28, %c0_29] : memref<32x32xf32, #tpu.memory_space<vmem>>, vector<32x32xf32>
    %c0_30 = arith.constant 0 : index
    %c0_31 = arith.constant 0 : index
    %18 = vector.load %arg14[%c0_30, %c0_31] : memref<32x32xf32, #tpu.memory_space<vmem>>, vector<32x32xf32>
    %19 = vector.broadcast %1 : vector<1x64xf32> to vector<32x64xf32>
    %20 = arith.mulf %0, %19 : vector<32x64xf32>
    %21 = vector.broadcast %2 : vector<1x64xf32> to vector<32x64xf32>
    %22 = arith.addf %20, %21 : vector<32x64xf32>
    %cst = arith.constant 0.000000e+00 : f32
    %23 = vector.broadcast %cst : f32 to vector<32x64xf32>
    %24 = arith.maximumf %22, %23 : vector<32x64xf32>
    %25 = arith.truncf %24 : vector<32x64xf32> to vector<32x64xbf16>
    %cst_32 = arith.constant dense<0.000000e+00> : vector<32x128xf32>
    %26 = tpu.matmul %25, %3, %cst_32 {dimension_numbers = #tpu.dot_dimension_numbers<[1], [0], [0], [1], [0, 0, 1, 1], [], []>} : vector<32x64xbf16>, vector<64x128xbf16>, vector<32x128xf32> -> vector<32x128xf32>
    %27 = vector.broadcast %4 : vector<1x128xf32> to vector<32x128xf32>
    %28 = arith.addf %26, %27 : vector<32x128xf32>
    %cst_33 = arith.constant dense<0.000000e+00> : vector<32x128xf32>
    %29 = tpu.matmul %28, %16, %cst_33 {dimension_numbers = #tpu.dot_dimension_numbers<[1], [0], [0], [1], [0, 0, 1, 1], [], []>} : vector<32x128xf32>, vector<128x128xf32>, vector<32x128xf32> -> vector<32x128xf32>
    %cst_34 = arith.constant dense<0.000000e+00> : vector<128xf32>
    %30 = vector.multi_reduction <add>, %29, %cst_34 [0] : vector<32x128xf32> to vector<128xf32>
    %31 = vector.shape_cast %30 : vector<128xf32> to vector<1x128xf32>
    %cst_35 = arith.constant 0.001953125 : f32
    %32 = vector.broadcast %cst_35 : f32 to vector<1x128xf32>
    %33 = arith.mulf %31, %32 : vector<1x128xf32>
    %34 = arith.mulf %28, %28 : vector<32x128xf32>
    %cst_36 = arith.constant dense<0.000000e+00> : vector<32x128xf32>
    %35 = tpu.matmul %34, %16, %cst_36 {dimension_numbers = #tpu.dot_dimension_numbers<[1], [0], [0], [1], [0, 0, 1, 1], [], []>} : vector<32x128xf32>, vector<128x128xf32>, vector<32x128xf32> -> vector<32x128xf32>
    %cst_37 = arith.constant dense<0.000000e+00> : vector<128xf32>
    %36 = vector.multi_reduction <add>, %35, %cst_37 [0] : vector<32x128xf32> to vector<128xf32>
    %37 = vector.shape_cast %36 : vector<128xf32> to vector<1x128xf32>
    %cst_38 = arith.constant 0.001953125 : f32
    %38 = vector.broadcast %cst_38 : f32 to vector<1x128xf32>
    %39 = arith.mulf %37, %38 : vector<1x128xf32>
    %40 = arith.mulf %33, %33 : vector<1x128xf32>
    %41 = arith.subf %39, %40 : vector<1x128xf32>
    %cst_39 = arith.constant 0.000000e+00 : f32
    %42 = vector.broadcast %cst_39 : f32 to vector<1x128xf32>
    %43 = arith.maximumf %41, %42 : vector<1x128xf32>
    %cst_40 = arith.constant 9.99999974E-6 : f32
    %44 = vector.broadcast %cst_40 : f32 to vector<1x128xf32>
    %45 = arith.addf %43, %44 : vector<1x128xf32>
    %46 = math.rsqrt %45 : vector<1x128xf32>
    %47 = arith.mulf %5, %46 : vector<1x128xf32>
    %48 = arith.mulf %33, %47 : vector<1x128xf32>
    %49 = arith.subf %6, %48 : vector<1x128xf32>
    %50 = vector.broadcast %47 : vector<1x128xf32> to vector<32x128xf32>
    %51 = arith.mulf %28, %50 : vector<32x128xf32>
    %52 = vector.broadcast %49 : vector<1x128xf32> to vector<32x128xf32>
    %53 = arith.addf %51, %52 : vector<32x128xf32>
    %cst_41 = arith.constant 0.000000e+00 : f32
    %54 = vector.broadcast %cst_41 : f32 to vector<32x128xf32>
    %55 = arith.maximumf %53, %54 : vector<32x128xf32>
    %56 = arith.truncf %55 : vector<32x128xf32> to vector<32x128xbf16>
    %cst_42 = arith.constant dense<0.000000e+00> : vector<32x128xf32>
    %57 = tpu.matmul %56, %10, %cst_42 {dimension_numbers = #tpu.dot_dimension_numbers<[1], [0], [0], [1], [0, 0, 1, 1], [], []>} : vector<32x128xbf16>, vector<128x128xbf16>, vector<32x128xf32> -> vector<32x128xf32>
    %cst_43 = arith.constant dense<0.000000e+00> : vector<32x128xf32>
    %58 = tpu.matmul %56, %8, %cst_43 {dimension_numbers = #tpu.dot_dimension_numbers<[1], [0], [0], [1], [0, 0, 1, 1], [], []>} : vector<32x128xbf16>, vector<128x128xbf16>, vector<32x128xf32> -> vector<32x128xf32>
    %cst_44 = arith.constant dense<0.000000e+00> : vector<32x128xf32>
    %59 = tpu.matmul %56, %12, %cst_44 {dimension_numbers = #tpu.dot_dimension_numbers<[1], [0], [0], [1], [0, 0, 1, 1], [], []>} : vector<32x128xbf16>, vector<128x128xbf16>, vector<32x128xf32> -> vector<32x128xf32>
    %cst_45 = arith.constant dense<0.000000e+00> : vector<32x128xf32>
    %60 = tpu.matmul %17, %58, %cst_45 {dimension_numbers = #tpu.dot_dimension_numbers<[1], [0], [0], [1], [0, 0, 1, 1], [], []>} : vector<32x32xf32>, vector<32x128xf32>, vector<32x128xf32> -> vector<32x128xf32>
    %61 = arith.addf %57, %60 : vector<32x128xf32>
    %cst_46 = arith.constant dense<0.000000e+00> : vector<32x128xf32>
    %62 = tpu.matmul %18, %59, %cst_46 {dimension_numbers = #tpu.dot_dimension_numbers<[1], [0], [0], [1], [0, 0, 1, 1], [], []>} : vector<32x32xf32>, vector<32x128xf32>, vector<32x128xf32> -> vector<32x128xf32>
    %63 = arith.addf %61, %62 : vector<32x128xf32>
    %64 = vector.broadcast %13 : vector<1x128xf32> to vector<32x128xf32>
    %65 = arith.addf %63, %64 : vector<32x128xf32>
    %cst_47 = arith.constant dense<0.000000e+00> : vector<32x128xf32>
    %66 = tpu.matmul %65, %16, %cst_47 {dimension_numbers = #tpu.dot_dimension_numbers<[1], [0], [0], [1], [0, 0, 1, 1], [], []>} : vector<32x128xf32>, vector<128x128xf32>, vector<32x128xf32> -> vector<32x128xf32>
    %cst_48 = arith.constant dense<0.000000e+00> : vector<128xf32>
    %67 = vector.multi_reduction <add>, %66, %cst_48 [0] : vector<32x128xf32> to vector<128xf32>
    %68 = vector.shape_cast %67 : vector<128xf32> to vector<1x128xf32>
    %cst_49 = arith.constant 0.001953125 : f32
    %69 = vector.broadcast %cst_49 : f32 to vector<1x128xf32>
    %70 = arith.mulf %68, %69 : vector<1x128xf32>
    %71 = arith.mulf %65, %65 : vector<32x128xf32>
    %cst_50 = arith.constant dense<0.000000e+00> : vector<32x128xf32>
    %72 = tpu.matmul %71, %16, %cst_50 {dimension_numbers = #tpu.dot_dimension_numbers<[1], [0], [0], [1], [0, 0, 1, 1], [], []>} : vector<32x128xf32>, vector<128x128xf32>, vector<32x128xf32> -> vector<32x128xf32>
    %cst_51 = arith.constant dense<0.000000e+00> : vector<128xf32>
    %73 = vector.multi_reduction <add>, %72, %cst_51 [0] : vector<32x128xf32> to vector<128xf32>
    %74 = vector.shape_cast %73 : vector<128xf32> to vector<1x128xf32>
    %cst_52 = arith.constant 0.001953125 : f32
    %75 = vector.broadcast %cst_52 : f32 to vector<1x128xf32>
    %76 = arith.mulf %74, %75 : vector<1x128xf32>
    %77 = arith.mulf %70, %70 : vector<1x128xf32>
    %78 = arith.subf %76, %77 : vector<1x128xf32>
    %cst_53 = arith.constant 0.000000e+00 : f32
    %79 = vector.broadcast %cst_53 : f32 to vector<1x128xf32>
    %80 = arith.maximumf %78, %79 : vector<1x128xf32>
    %cst_54 = arith.constant 9.99999974E-6 : f32
    %81 = vector.broadcast %cst_54 : f32 to vector<1x128xf32>
    %82 = arith.addf %80, %81 : vector<1x128xf32>
    %83 = math.rsqrt %82 : vector<1x128xf32>
    %84 = arith.mulf %14, %83 : vector<1x128xf32>
    %85 = arith.mulf %70, %84 : vector<1x128xf32>
    %86 = arith.subf %15, %85 : vector<1x128xf32>
    %87 = vector.broadcast %84 : vector<1x128xf32> to vector<32x128xf32>
    %88 = arith.mulf %65, %87 : vector<32x128xf32>
    %89 = vector.broadcast %86 : vector<1x128xf32> to vector<32x128xf32>
    %90 = arith.addf %88, %89 : vector<32x128xf32>
    %cst_55 = arith.constant 0.000000e+00 : f32
    %91 = vector.broadcast %cst_55 : f32 to vector<32x128xf32>
    %92 = arith.maximumf %90, %91 : vector<32x128xf32>
    %93 = arith.truncf %92 : vector<32x128xf32> to vector<32x128xbf16>
    %c0_56 = arith.constant 0 : index
    %c0_57 = arith.constant 0 : index
    %94 = vector.load %arg15[%c0_56, %c0_57] : memref<128x512xbf16, #tpu.memory_space<vmem>>, vector<128x512xbf16>
    %cst_58 = arith.constant dense<0.000000e+00> : vector<32x512xf32>
    %95 = tpu.matmul %93, %94, %cst_58 {dimension_numbers = #tpu.dot_dimension_numbers<[1], [0], [0], [1], [0, 0, 1, 1], [], []>} : vector<32x128xbf16>, vector<128x512xbf16>, vector<32x512xf32> -> vector<32x512xf32>
    %96 = arith.truncf %0 : vector<32x64xf32> to vector<32x64xbf16>
    %c0_59 = arith.constant 0 : index
    %c0_60 = arith.constant 0 : index
    %97 = vector.load %arg16[%c0_59, %c0_60] : memref<64x512xbf16, #tpu.memory_space<vmem>>, vector<64x512xbf16>
    %cst_61 = arith.constant dense<0.000000e+00> : vector<32x512xf32>
    %98 = tpu.matmul %96, %97, %cst_61 {dimension_numbers = #tpu.dot_dimension_numbers<[1], [0], [0], [1], [0, 0, 1, 1], [], []>} : vector<32x64xbf16>, vector<64x512xbf16>, vector<32x512xf32> -> vector<32x512xf32>
    %99 = arith.addf %95, %98 : vector<32x512xf32>
    %c0_62 = arith.constant 0 : index
    %c0_63 = arith.constant 0 : index
    %100 = vector.load %arg17[%c0_62, %c0_63] : memref<1x512xf32, #tpu.memory_space<vmem>>, vector<1x512xf32>
    %101 = vector.broadcast %100 : vector<1x512xf32> to vector<32x512xf32>
    %102 = arith.addf %99, %101 : vector<32x512xf32>
    %c0_64 = arith.constant 0 : index
    %c0_65 = arith.constant 0 : index
    %103 = vector.load %arg18[%c0_64, %c0_65] : memref<32x512xf32, #tpu.memory_space<vmem>>, vector<32x512xf32>
    tpu.vector_store %arg18[%c0_64, %c0_65], %102 {strides = array<i32>} : memref<32x512xf32, #tpu.memory_space<vmem>>, vector<32x512xf32>,
    return
  }
  func.func @transform_0(%arg0: i32) -> (i32, i32) {
    %c0_i32 = arith.constant 0 : i32
    %c0_i32_0 = arith.constant 0 : i32
    %c0_i32_1 = arith.constant 0 : i32
    return %c0_i32, %c0_i32_0 : i32, i32
  }
  func.func @transform_1(%arg0: i32) -> (i32, i32) {
    %c0_i32 = arith.constant 0 : i32
    %c0_i32_0 = arith.constant 0 : i32
    %c0_i32_1 = arith.constant 0 : i32
    return %c0_i32, %c0_i32_0 : i32, i32
  }
  func.func @transform_2(%arg0: i32) -> (i32, i32) {
    %c0_i32 = arith.constant 0 : i32
    %c0_i32_0 = arith.constant 0 : i32
    %c0_i32_1 = arith.constant 0 : i32
    return %c0_i32, %c0_i32_0 : i32, i32
  }
  func.func @transform_3(%arg0: i32) -> (i32, i32) {
    %c0_i32 = arith.constant 0 : i32
    %c0_i32_0 = arith.constant 0 : i32
    %c0_i32_1 = arith.constant 0 : i32
    return %c0_i32, %c0_i32_0 : i32, i32
  }
  func.func @transform_4(%arg0: i32) -> (i32, i32) {
    %c0_i32 = arith.constant 0 : i32
    %c0_i32_0 = arith.constant 0 : i32
    %c0_i32_1 = arith.constant 0 : i32
    return %c0_i32, %c0_i32_0 : i32, i32
  }
  func.func @transform_5(%arg0: i32) -> (i32, i32) {
    %c0_i32 = arith.constant 0 : i32
    %c0_i32_0 = arith.constant 0 : i32
    %c0_i32_1 = arith.constant 0 : i32
    return %c0_i32, %c0_i32_0 : i32, i32
  }
  func.func @transform_6(%arg0: i32) -> (i32, i32) {
    %c0_i32 = arith.constant 0 : i32
    %c0_i32_0 = arith.constant 0 : i32
    %c0_i32_1 = arith.constant 0 : i32
    return %c0_i32, %c0_i32_0 : i32, i32
  }
  func.func @transform_7(%arg0: i32) -> (i32, i32, i32) {
    %c0_i32 = arith.constant 0 : i32
    %c0_i32_0 = arith.constant 0 : i32
    %c0_i32_1 = arith.constant 0 : i32
    %c0_i32_2 = arith.constant 0 : i32
    return %c0_i32, %c0_i32_0, %c0_i32_1 : i32, i32, i32
  }
  func.func @transform_8(%arg0: i32) -> (i32, i32) {
    %c0_i32 = arith.constant 0 : i32
    %c0_i32_0 = arith.constant 0 : i32
    %c0_i32_1 = arith.constant 0 : i32
    return %c0_i32, %c0_i32_0 : i32, i32
  }
  func.func @transform_9(%arg0: i32) -> (i32, i32) {
    %c0_i32 = arith.constant 0 : i32
    %c0_i32_0 = arith.constant 0 : i32
    %c0_i32_1 = arith.constant 0 : i32
    return %c0_i32, %c0_i32_0 : i32, i32
  }
  func.func @transform_10(%arg0: i32) -> (i32, i32) {
    %c0_i32 = arith.constant 0 : i32
    %c0_i32_0 = arith.constant 0 : i32
    %c0_i32_1 = arith.constant 0 : i32
    return %c0_i32, %c0_i32_0 : i32, i32
  }
  func.func @transform_11(%arg0: i32) -> (i32, i32) {
    %c0_i32 = arith.constant 0 : i32
    %c0_i32_0 = arith.constant 0 : i32
    %c0_i32_1 = arith.constant 0 : i32
    return %c0_i32, %c0_i32_0 : i32, i32
  }
  func.func @transform_12(%arg0: i32) -> (i32, i32) {
    %c0_i32 = arith.constant 0 : i32
    %c0_i32_0 = arith.constant 0 : i32
    %c0_i32_1 = arith.constant 0 : i32
    return %c0_i32, %c0_i32_0 : i32, i32
  }
  func.func @transform_13(%arg0: i32) -> (i32, i32) {
    %c0_i32 = arith.constant 0 : i32
    %c0_i32_0 = arith.constant 0 : i32
    %c0_i32_1 = arith.constant 0 : i32
    return %c0_i32, %c0_i32_0 : i32, i32
  }
  func.func @transform_14(%arg0: i32) -> (i32, i32) {
    %c0_i32 = arith.constant 0 : i32
    %c0_i32_0 = arith.constant 0 : i32
    %c0_i32_1 = arith.constant 0 : i32
    return %c0_i32, %c0_i32_0 : i32, i32
  }
  func.func @transform_15(%arg0: i32) -> (i32, i32) {
    %c0_i32 = arith.constant 0 : i32
    %c0_i32_0 = arith.constant 0 : i32
    %c0_i32_1 = arith.constant 0 : i32
    return %c0_i32, %c0_i32_0 : i32, i32
  }
  func.func @transform_16(%arg0: i32) -> (i32, i32) {
    %c0_i32 = arith.constant 0 : i32
    %c0_i32_0 = arith.constant 0 : i32
    %c0_i32_1 = arith.constant 0 : i32
    return %c0_i32, %c0_i32_0 : i32, i32
  }
  func.func @transform_17(%arg0: i32) -> (i32, i32) {
    %c0_i32 = arith.constant 0 : i32
    %c0_i32_0 = arith.constant 0 : i32
    %c0_i32_1 = arith.constant 0 : i32
    return %c0_i32, %c0_i32_0 : i32, i32
  }
}

</mosaic_0001>

<bundles_post_ra>
// kernel: tile.18
= control target key start
LH: loop header
LB: loop body
LE: loop exit
PB: predicated region body
PF: predicated region fallthrough
CT: control target
= control target key end

     0   :  { %s28_s0 = inlined_call_operand.vmem [shape: f32[4], index: 0, kind: input, shape index: {}]   ;;  %s29_s1 = inlined_call_operand.vmem [shape: f32[16,4], index: 1, kind: output, shape index: {}]  }
   0x1   :  { %v4_v0 = vld [vmem:[%s28_s0] ss:$0 sm:$0xff] }
   0x2   :  { %5 = vst [vmem:[%s29_s1] sm:$0xff] %v4_v0  ;;  %8 = vst [vmem:[%s29_s1 + $0x8] sm:$0xff] %v4_v0 }

// kernel: tile.19
= control target key start
LH: loop header
LB: loop body
LE: loop exit
PB: predicated region body
PF: predicated region fallthrough
CT: control target
= control target key end

     0   :  { %s131_s10 = smov 60   ;;  %s132_s11 = smov 52   ;;  %vm3_vm0 = vcmask 31744   ;;  %vm9_vm1 = vcmask 523744   ;;  %vm15_vm2 = vcmask 490944   ;;  %vm21_vm3 = vcmask 458144   ;;  %s207_s0 = inlined_call_operand.vmem [shape: f32[16,4], index: 0, kind: input, shape index: {}]   ;;  %s208_s1 = inlined_call_operand.vmem [shape: f32[1,64], index: 1, kind: output, shape index: {}]  }
   0x1   :  { %v101_v0 = vld [vmem:[%s207_s0 + $0xf] sm:$0x1]   ;;  %v103_v1 = vld [vmem:[%s207_s0 + $0xd] sm:$0x1]   ;;  %v102_v2 = vld [vmem:[%s207_s0 + $0xe] sm:$0x1]  }
   0x2   :  { %7 = vrot.lane.b32.xlu0 %v101_v0, %s131_s10  ;;  %19 = vrot.lane.b32.xlu1 %v103_v1, %s132_s11  ;;  %v104_v3 = vld [vmem:[%s207_s0 + $0xc] sm:$0x1]   ;;  %s133_s16 = smov 56   ;;  %s134_s17 = smov 48   ;;  %v105_v4 = vld [vmem:[%s207_s0 + $0xb] sm:$0x1]  }
   0x3   :  { %v106_v5 = vld [vmem:[%s207_s0 + $0xa] sm:$0x1]   ;;  %v2_v6 = vld [vmem:[%s207_s0] sm:$0x1]   ;;  %s135_s24 = smov 44   ;;  %s136_s25 = smov 40  }
   0x4   :  { %4 = vst.msk [vmem:[#allocation0] sm:$0x1] %vm3_vm0, %v2_v6   ;;  %v107_v7 = vld [vmem:[%s207_s0 + $0x9] sm:$0x1]   ;;  %v108_v8 = vld [vmem:[%s207_s0 + $0x8] sm:$0x1]  }
   0x5   :  { %s137_s30 = smov 36   ;;  %s138_s2 = smov 32   ;;  %v109_v9 = vld [vmem:[%s207_s0 + $0x7] sm:$0x1]   ;;  %v110_v10 = vld [vmem:[%s207_s0 + $0x6] sm:$0x1]  }
   0x6   :  { %13 = vrot.lane.b32.xlu0 %v102_v2, %s133_s16  ;;  %25 = vrot.lane.b32.xlu1 %v104_v3, %s134_s17  ;;  %s139_s7 = smov 28   ;;  %s140_s8 = smov 24   ;;  %v111_v11 = vld [vmem:[%s207_s0 + $0x5] sm:$0x1]   ;;  %v112_v12 = vld [vmem:[%s207_s0 + $0x4] sm:$0x1]  }
   0x7   :  { %s141_s13 = smov 20   ;;  %s142_s14 = smov 16   ;;  %v113_v13 = vld [vmem:[%s207_s0 + $0x3] sm:$0x1]   ;;  %v114_v14 = vld [vmem:[%s207_s0 + $0x2] sm:$0x1]  }
   0x8   :  { %s143_s19 = smov 12   ;;  %s144_s20 = smov 8   ;;  %v115_v15 = vld [vmem:[%s207_s0 + $0x1] sm:$0x1]   ;;  %vm27_vm4 = vcmask 425344   ;;  %vm33_vm5 = vcmask 392544  }
   0x9   :  { %s145_s0 = smov 4   ;;  %vm39_vm6 = vcmask 359744   ;;  %vm45_vm7 = vcmask 326944   ;;  %vm51_vm8 = vcmask 294144   ;;  %vm57_vm9 = vcmask 261344  }
   0xa   :  { %31 = vrot.lane.b32.xlu0 %v105_v4, %s135_s24  ;;  %37 = vrot.lane.b32.xlu1 %v106_v5, %s136_s25  ;;  %vm63_vm10 = vcmask 228544   ;;  %vm69_vm11 = vcmask 195744   ;;  %vm75_vm12 = vcmask 162944   ;;  %vm81_vm13 = vcmask 130144  }
   0xb   :  { %vm87_vm14 = vcmask 97344   ;;  %vm93_vm15 = vcmask 64544  }
   0xe   :  { %43 = vrot.lane.b32.xlu0 %v107_v7, %s137_s30  ;;  %49 = vrot.lane.b32.xlu1 %v108_v8, %s138_s2 }
  0x12   :  { %55 = vrot.lane.b32.xlu0 %v109_v9, %s139_s7  ;;  %61 = vrot.lane.b32.xlu1 %v110_v10, %s140_s8 }
  0x16   :  { %67 = vrot.lane.b32.xlu0 %v111_v11, %s141_s13  ;;  %73 = vrot.lane.b32.xlu1 %v112_v12, %s142_s14 }
  0x1a   :  { %79 = vrot.lane.b32.xlu0 %v113_v13, %s143_s19  ;;  %85 = vrot.lane.b32.xlu1 %v114_v14, %s144_s20 }
  0x1e   :  { %91 = vrot.lane.b32.xlu0 %v115_v15, %s145_s0 }
  0x74   :  { %v8_v16 = vpop.permute.xlu0 %7   ;;  %v20_v17 = vpop.permute.xlu1 %19  }
  0x75   :  { %10 = vst.msk [vmem:[#allocation0] sm:$0x1] %vm9_vm1, %v8_v16  }
  0x78   :  { %v14_v18 = vpop.permute.xlu0 %13   ;;  %v26_v19 = vpop.permute.xlu1 %25  }
  0x79   :  { %16 = vst.msk [vmem:[#allocation0] sm:$0x1] %vm15_vm2, %v14_v18  }
  0x7a   :  { %22 = vst.msk [vmem:[#allocation0] sm:$0x1] %vm21_vm3, %v20_v17  }
  0x7b   :  { %28 = vst.msk [vmem:[#allocation0] sm:$0x1] %vm27_vm4, %v26_v19  }
  0x7c   :  { %v32_v20 = vpop.permute.xlu0 %31   ;;  %v38_v21 = vpop.permute.xlu1 %37  }
  0x7d   :  { %34 = vst.msk [vmem:[#allocation0] sm:$0x1] %vm33_vm5, %v32_v20  }
  0x7e   :  { %40 = vst.msk [vmem:[#allocation0] sm:$0x1] %vm39_vm6, %v38_v21  }
  0x80   :  { %v44_v22 = vpop.permute.xlu0 %43   ;;  %v50_v23 = vpop.permute.xlu1 %49  }
  0x81   :  { %46 = vst.msk [vmem:[#allocation0] sm:$0x1] %vm45_vm7, %v44_v22  }
  0x82   :  { %52 = vst.msk [vmem:[#allocation0] sm:$0x1] %vm51_vm8, %v50_v23  }
  0x84   :  { %v56_v24 = vpop.permute.xlu0 %55   ;;  %v62_v25 = vpop.permute.xlu1 %61  }
  0x85   :  { %58 = vst.msk [vmem:[#allocation0] sm:$0x1] %vm57_vm9, %v56_v24  }
  0x86   :  { %64 = vst.msk [vmem:[#allocation0] sm:$0x1] %vm63_vm10, %v62_v25  }
  0x88   :  { %v68_v26 = vpop.permute.xlu0 %67   ;;  %v74_v27 = vpop.permute.xlu1 %73  }
  0x89   :  { %70 = vst.msk [vmem:[#allocation0] sm:$0x1] %vm69_vm11, %v68_v26  }
  0x8a   :  { %76 = vst.msk [vmem:[#allocation0] sm:$0x1] %vm75_vm12, %v74_v27  }
  0x8c   :  { %v80_v28 = vpop.permute.xlu0 %79   ;;  %v86_v29 = vpop.permute.xlu1 %85  }
  0x8d   :  { %82 = vst.msk [vmem:[#allocation0] sm:$0x1] %vm81_vm13, %v80_v28  }
  0x8e   :  { %88 = vst.msk [vmem:[#allocation0] sm:$0x1] %vm87_vm14, %v86_v29  }
  0x90   :  { %v92_v30 = vpop.permute.xlu0 %91  }
  0x91   :  { %94 = vst.msk [vmem:[#allocation0] sm:$0x1] %vm93_vm15, %v92_v30  }
  0x98   :  { %v98_v31 = vld [vmem:[#allocation0] sm:$0x1] }
  0x99   :  { %100 = vst [vmem:[%s208_s1] sm:$0x1] %v98_v31 }

// kernel: preact_bottleneck_forward.1
= control target key start
LH: loop header
LB: loop body
LE: loop exit
PB: predicated region body
PF: predicated region fallthrough
CT: control target
= control target key end

     0   :  { %vm207_vm0 = vcmask 523264   ;;  %vm685_vm1 = vcmask 261120   ;;  %s3218_s3 = inlined_call_operand.vmem [shape: bf16[64,128], index: 3, kind: input, shape index: {}]   ;;  %s3219_s0 = inlined_call_operand.vmem [shape: f32[32,64], index: 0, kind: input, shape index: {}]   ;;  %s3220_s1 = inlined_call_operand.vmem [shape: f32[1,64], index: 1, kind: input, shape index: {}]   ;;  %s3221_s2 = inlined_call_operand.vmem [shape: f32[1,64], index: 2, kind: input, shape index: {}]   ;;  %s3222_s11 = inlined_call_operand.vmem [shape: f32[128,128], index: 11, kind: input, shape index: {}]   ;;  %s3223_s4 = inlined_call_operand.vmem [shape: f32[1,128], index: 4, kind: input, shape index: {}]   ;;  %s3224_s7 = inlined_call_operand.vmem [shape: bf16[3,128,128], index: 7, kind: input, shape index: {}]   ;;  %s3225_s5 = inlined_call_operand.vmem [shape: f32[1,128], index: 5, kind: input, shape index: {}]   ;;  %s3226_s6 = inlined_call_operand.vmem [shape: f32[1,128], index: 6, kind: input, shape index: {}]   ;;  %s3227_s12 = inlined_call_operand.vmem [shape: f32[32,32], index: 12, kind: input, shape index: {}]   ;;  %s3228_s13 = inlined_call_operand.vmem [shape: f32[32,32], index: 13, kind: input, shape index: {}]   ;;  %s3229_s15 = inlined_call_operand.vmem [shape: bf16[64,512], index: 15, kind: input, shape index: {}]   ;;  %s3230_s8 = inlined_call_operand.vmem [shape: f32[1,128], index: 8, kind: input, shape index: {}]   ;;  %s3231_s14 = inlined_call_operand.vmem [shape: bf16[128,512], index: 14, kind: input, shape index: {}]   ;;  %s3232_s9 = inlined_call_operand.vmem [shape: f32[1,128], index: 9, kind: input, shape index: {}]   ;;  %s3233_s10 = inlined_call_operand.vmem [shape: f32[1,128], index: 10, kind: input, shape index: {}]   ;;  %s3234_s16 = inlined_call_operand.vmem [shape: f32[1,512], index: 16, kind: input, shape index: {}]   ;;  %s3235_s17 = inlined_call_operand.vmem [shape: f32[32,512], index: 17, kind: output, shape index: {}]  }
   0x1   :  { %3238 = sst [smem:[#allocation2_spill]] %s3218_s3  ;;  %v1817_v5 = vld [vmem:[%s3220_s1] ss:$0 sm:$0xff]  ;;  %v128_v22 = vld [vmem:[%s3222_s11 + $0x8] sm:$0xff]  ;;  %v129_v27 = vld [vmem:[%s3222_s11 + $0x10] sm:$0xff] }
   0x2   :  { %3239 = sst [smem:[#allocation3_spill]] %s3219_s0  ;;  %s3240_s26 = sld [smem:[#allocation2_spill]]  ;;  %v1818_v6 = vld [vmem:[%s3221_s2] ss:$0 sm:$0xff]  ;;  %v130_v28 = vld [vmem:[%s3222_s11 + $0x18] sm:$0xff]  ;;  %v132_v32 = vld [vmem:[%s3222_s11 + $0x28] sm:$0xff] }
   0x3   :  { %s3241_s19 = sld [smem:[#allocation3_spill]]  ;;  %v127_v21 = vld [vmem:[%s3222_s11] sm:$0xff]  ;;  %v2705_v30 = vpack.c.bf16 %v130_v28, %v129_v27  ;;  %v133_v34 = vld [vmem:[%s3222_s11 + $0x30] sm:$0xff]  ;;  %v134_v35 = vld [vmem:[%s3222_s11 + $0x38] sm:$0xff] }
   0x4   :  { %v2695_v26 = vpack.c.bf16 %v128_v22, %v127_v21  ;;  %v131_v31 = vld [vmem:[%s3222_s11 + $0x20] sm:$0xff]  ;;  %v2726_v36 = vpack.c.bf16 %v134_v35, %v133_v34  ;;  %v136_v38 = vld [vmem:[%s3222_s11 + $0x48] sm:$0xff]  ;;  %v137_v40 = vld [vmem:[%s3222_s11 + $0x50] sm:$0xff] }
   0x5   :  { %v2716_v33 = vpack.c.bf16 %v132_v32, %v131_v31  ;;  %v135_v37 = vld [vmem:[%s3222_s11 + $0x40] sm:$0xff]  ;;  %v138_v41 = vld [vmem:[%s3222_s11 + $0x58] sm:$0xff]  ;;  %v140_v44 = vld [vmem:[%s3222_s11 + $0x68] sm:$0xff] }
   0x6   :  { %v2736_v39 = vpack.c.bf16 %v136_v38, %v135_v37  ;;  %v2746_v42 = vpack.c.bf16 %v138_v41, %v137_v40  ;;  %v139_v43 = vld [vmem:[%s3222_s11 + $0x60] sm:$0xff]  ;;  %v141_v46 = vld [vmem:[%s3222_s11 + $0x70] sm:$0xff]  ;;  %v142_v47 = vld [vmem:[%s3222_s11 + $0x78] sm:$0xff] }
   0x7   :  { %v2756_v45 = vpack.c.bf16 %v140_v44, %v139_v43  ;;  %v2767_v48 = vpack.c.bf16 %v142_v47, %v141_v46  ;;  %v1819_v49 = vld [vmem:[%s3223_s4] ss:$0 sm:$0xff] }
   0x8   :  { %v2456_v0 = vld [vmem:[%s3240_s26] sm:$0xff]   ;;  %v2457_v1 = vld [vmem:[%s3240_s26 + $0x8] sm:$0xff]   ;;  %v2458_v2 = vld [vmem:[%s3240_s26 + $0x10] sm:$0xff]  }
   0x9   :  { %2043 = vmatprep.subr.bf16.mxu1 %v2456_v0  ;;  %v57_v3 = vld [vmem:[%s3241_s19] sm:$0xff]  ;;  %v58_v4 = vld [vmem:[%s3241_s19 + $0x8] sm:$0xff]  ;;  %v2677_v10 = vld [vmem:[%s3241_s19 + $0x10] sm:$0xff] }
   0xa   :  { %2044 = vmatpush3.bf16.msra.mxu1 %v2456_v0  ;;  %v157_v7 = vmul.f32 %v1817_v5, %v57_v3  ;;  %v158_v8 = vmul.f32 %v1817_v5, %v58_v4  ;;  %v2672_v9 = vpack.c.bf16 %v58_v4, %v57_v3  ;;  %v2682_v11 = vld [vmem:[%s3241_s19 + $0x18] sm:$0xff]  ;;  %v159_v12 = vmul.f32 %v1817_v5, %v2677_v10  ;;  %v2460_v62 = vld [vmem:[%s3224_s7] sm:$0xff]   ;;  %v2462_v0 = vld [vmem:[%s3224_s7 + $0x8] sm:$0xff]  }
   0xb   :  { %2045 = vmatprep.subr.bf16.mxu1 %v2457_v1  ;;  %v160_v13 = vmul.f32 %v1817_v5, %v2682_v11  ;;  %v2459_v16 = vld [vmem:[%s3240_s26 + $0x18] sm:$0xff]   ;;  %v2461_v63 = vld [vmem:[%s3224_s7 + $0x80] sm:$0xff]   ;;  %v2465_v3 = vld [vmem:[%s3224_s7 + $0x90] sm:$0xff]  }
   0xc   :  { %v167_v14 = vadd.f32 %v1818_v6, %v157_v7  ;;  %v168_v15 = vadd.f32 %v1818_v6, %v158_v8  ;;  %v169_v17 = vadd.f32 %v1818_v6, %v159_v12  ;;  %2151 = vmatprep.subr.bf16.mxu0 %v2461_v63  ;;  %v2466_v4 = vld [vmem:[%s3224_s7 + $0x18] sm:$0xff]   ;;  %v2469_v7 = vld [vmem:[%s3224_s7 + $0xa0] sm:$0xff]   ;;  %v2470_v8 = vld [vmem:[%s3224_s7 + $0x28] sm:$0xff]  }
   0xd   :  { %v170_v18 = vadd.f32 %v1818_v6, %v160_v13  ;;  %2152 = vmatpush3.bf16.msra.mxu0 %v2461_v63  ;;  %v2467_v5 = vld [vmem:[%s3224_s7 + $0x98] sm:$0xff]   ;;  %v2468_v6 = vld [vmem:[%s3224_s7 + $0x20] sm:$0xff]   ;;  %v2471_v12 = vld [vmem:[%s3224_s7 + $0xa8] sm:$0xff]  }
   0xe   :  { %2046 = vmatpush3.bf16.msra.mxu1 %v2457_v1  ;;  %v171_v19 = vmax.f32 %v167_v14, 0.0  ;;  %v172_v20 = vmax.f32 %v168_v15, 0.0  ;;  %v173_v23 = vmax.f32 %v169_v17, 0.0  ;;  %v2463_v1 = vld [vmem:[%s3224_s7 + $0x88] sm:$0xff]   ;;  %v2472_v13 = vld [vmem:[%s3224_s7 + $0x30] sm:$0xff]   ;;  %v2474_v15 = vld [vmem:[%s3224_s7 + $0x38] sm:$0xff]  }
   0xf   :  { %2047 = vmatprep.subr.bf16.mxu1 %v2458_v2  ;;  %v174_v24 = vmax.f32 %v170_v18, 0.0  ;;  %2153 = vmatprep.subr.bf16.mxu0 %v2463_v1  ;;  %v2473_v14 = vld [vmem:[%s3224_s7 + $0xb0] sm:$0xff]   ;;  %v72_v63 = vld [vmem:[%s3225_s5] sm:$0x1] }
  0x10   :  { %v175_v25 = vpack.c.bf16 %v172_v20, %v171_v19 }
  0x11   :  { %v176_v29 = vpack.c.bf16 %v174_v24, %v173_v23  ;;  %2154 = vmatpush3.bf16.msra.mxu0 %v2463_v1 }
  0x12   :  { %2048 = vmatpush3.bf16.msra.mxu1 %v2458_v2  ;;  %2051 = vmatprep.mubr.msk.bf16.mxu1 %vm207_vm0, %v175_v25  ;;  %v2464_v2 = vld [vmem:[%s3224_s7 + $0x10] sm:$0xff]  }
  0x13   :  { %2049 = vmatprep.subr.bf16.mxu1 %v2459_v16  ;;  %2155 = vmatprep.subr.bf16.mxu0 %v2465_v3 }
  0x15   :  { %2156 = vmatpush3.bf16.msra.mxu0 %v2465_v3  ;;  %v73_v3 = vld [vmem:[%s3226_s6] sm:$0x1] }
  0x16   :  { %2050 = vmatpush3.bf16.msra.mxu1 %v2459_v16  ;;  %2157 = vmatprep.subr.bf16.mxu0 %v2467_v5  ;;  %v2475_v16 = vld [vmem:[%s3224_s7 + $0xb8] sm:$0xff]  }
  0x17   :  { %2296 = vmatprep.subr.bf16.mxu1 %v2695_v26 }
  0x19   :  { %2052 = vmatmul.mubr.msk.bf16.vlgmr.msra.gmra.mrb[0].mxu1 %vm207_vm0, %v176_v29  ;;  %2158 = vmatpush3.bf16.msra.mxu0 %v2467_v5 }
  0x1a   :  { %2298 = vmatpush3.bf16.msra.mxu1 %v2695_v26  ;;  %2159 = vmatprep.subr.bf16.mxu0 %v2469_v7 }
  0x1b   :  { %2300 = vmatprep.subr.bf16.mxu1 %v2705_v30 }
  0x1d   :  { %2160 = vmatpush3.bf16.msra.mxu0 %v2469_v7 }
  0x1e   :  { %2302 = vmatpush3.bf16.msra.mxu1 %v2705_v30  ;;  %2161 = vmatprep.subr.bf16.mxu0 %v2471_v12 }
  0x1f   :  { %2304 = vmatprep.subr.bf16.mxu1 %v2716_v33 }
  0x21   :  { %2162 = vmatpush3.bf16.msra.mxu0 %v2471_v12 }
  0x22   :  { %2306 = vmatpush3.bf16.msra.mxu1 %v2716_v33  ;;  %2163 = vmatprep.subr.bf16.mxu0 %v2473_v14 }
  0x23   :  { %2308 = vmatprep.subr.bf16.mxu1 %v2726_v36 }
  0x25   :  { %2164 = vmatpush3.bf16.msra.mxu0 %v2473_v14 }
  0x26   :  { %2310 = vmatpush3.bf16.msra.mxu1 %v2726_v36  ;;  %2165 = vmatprep.subr.bf16.mxu0 %v2475_v16 }
  0x27   :  { %2312 = vmatprep.subr.bf16.mxu1 %v2736_v39 }
  0x29   :  { %2166 = vmatpush3.bf16.msra.mxu0 %v2475_v16 }
  0x2a   :  { %2314 = vmatpush3.bf16.msra.mxu1 %v2736_v39 }
  0x2b   :  { %2316 = vmatprep.subr.bf16.mxu1 %v2746_v42 }
  0x2e   :  { %2318 = vmatpush3.bf16.msra.mxu1 %v2746_v42 }
  0x2f   :  { %2320 = vmatprep.subr.bf16.mxu1 %v2756_v45 }
  0x32   :  { %2322 = vmatpush3.bf16.msra.mxu1 %v2756_v45 }
  0x33   :  { %2324 = vmatprep.subr.bf16.mxu1 %v2767_v48 }
  0x36   :  { %2326 = vmatpush3.bf16.msra.mxu1 %v2767_v48 }
  0x37   :  { %2328 = vmatprep.subr.bf16.mxu1 %v2695_v26 }
  0xec   :  { %v2053_v50 = vpop.f32.mrb[0].mxu1 }
  0xed   :  { %v248_v51 = vpop.f32.mrb[1].mxu1  ;;  %v2780_v56 = vadd.f32 %v2053_v50, %v1819_v49 }
  0xee   :  { %v2775_v52 = vadd.f32 %v1819_v49, %v248_v51  ;;  %v2054_v53 = vpop.f32.mrb[2].mxu1 }
  0xef   :  { %v251_v54 = vpop.f32.mrb[3].mxu1  ;;  %v2785_v57 = vadd.f32 %v2054_v53, %v1819_v49  ;;  %v360_v60 = vmul.f32 %v2780_v56, %v2780_v56 }
  0xf0   :  { %v2777_v55 = vadd.f32 %v1819_v49, %v251_v54  ;;  %2087 = vmatprep.mubr.f32.mxu1 %v2775_v52  ;;  %v358_v58 = vmul.f32 %v2775_v52, %v2775_v52 }
  0xf1   :  { %v361_v61 = vmul.f32 %v2785_v57, %v2785_v57 }
  0xf2   :  { %2088 = vmatmul.mubr.f32.vlgmr.msra.gmra.mrb[4].mxu1 %v2777_v55  ;;  %v359_v59 = vmul.f32 %v2777_v55, %v2777_v55 }
  0xf3   :  { %2330 = vmatpush3.bf16.msra.mxu1 %v2695_v26  ;;  %2090 = vmatprep.mubr.f32.mxu1 %v2780_v56 }
  0xf4   :  { %2332 = vmatprep.subr.bf16.mxu1 %v2705_v30 }
  0xf6   :  { %2091 = vmatmul.mubr.f32.gmra.mrb[6].mxu1 %v2785_v57 }
  0xf7   :  { %2334 = vmatpush3.bf16.msra.mxu1 %v2705_v30  ;;  %2125 = vmatprep.mubr.f32.mxu1 %v358_v58 }
  0xf8   :  { %2336 = vmatprep.subr.bf16.mxu1 %v2716_v33 }
  0xfb   :  { %2338 = vmatpush3.bf16.msra.mxu1 %v2716_v33 }
  0xfc   :  { %2340 = vmatprep.subr.bf16.mxu1 %v2726_v36 }
  0xff   :  { %2342 = vmatpush3.bf16.msra.mxu1 %v2726_v36 }
 0x100   :  { %2344 = vmatprep.subr.bf16.mxu1 %v2736_v39 }
 0x103   :  { %2346 = vmatpush3.bf16.msra.mxu1 %v2736_v39 }
 0x104   :  { %2348 = vmatprep.subr.bf16.mxu1 %v2746_v42 }
 0x107   :  { %2350 = vmatpush3.bf16.msra.mxu1 %v2746_v42 }
 0x108   :  { %2352 = vmatprep.subr.bf16.mxu1 %v2756_v45 }
 0x10b   :  { %2354 = vmatpush3.bf16.msra.mxu1 %v2756_v45 }
 0x10c   :  { %2356 = vmatprep.subr.bf16.mxu1 %v2767_v48 }
 0x10f   :  { %2358 = vmatpush3.bf16.msra.mxu1 %v2767_v48 }
 0x110   :  { %2131 = vmatprep.subr.bf16.mxu1 %v2460_v62 }
 0x112   :  { %2126 = vmatmul.mubr.f32.vlgmr.msra.gmra.mrb[8].mxu1 %v359_v59 }
 0x113   :  { %2128 = vmatprep.mubr.f32.mxu1 %v360_v60  ;;  %2132 = vmatpush3.bf16.msra.mxu1 %v2460_v62 }
 0x114   :  { %2133 = vmatprep.subr.bf16.mxu1 %v2462_v0 }
 0x116   :  { %2129 = vmatmul.mubr.f32.gmra.mrb[10].mxu1 %v361_v61  ;;  %v466_v61 = vlaneseq }
 0x117   :  { %2134 = vmatpush3.bf16.msra.mxu1 %v2462_v0 }
 0x118   :  { %2135 = vmatprep.subr.bf16.mxu1 %v2464_v2  ;;  %v2858_v62 = vshrl.u32 %v466_v61, 7 }
 0x11a   :  { %v2864_v0 = vsub.s32 0, %v2858_v62 }
 0x11b   :  { %2136 = vmatpush3.bf16.msra.mxu1 %v2464_v2 }
 0x11c   :  { %2137 = vmatprep.subr.bf16.mxu1 %v2466_v4 }
 0x11f   :  { %2138 = vmatpush3.bf16.msra.mxu1 %v2466_v4 }
 0x120   :  { %2139 = vmatprep.subr.bf16.mxu1 %v2468_v6 }
 0x123   :  { %2140 = vmatpush3.bf16.msra.mxu1 %v2468_v6 }
 0x124   :  { %2141 = vmatprep.subr.bf16.mxu1 %v2470_v8 }
 0x127   :  { %2142 = vmatpush3.bf16.msra.mxu1 %v2470_v8 }
 0x128   :  { %2143 = vmatprep.subr.bf16.mxu1 %v2472_v13 }
 0x12b   :  { %2144 = vmatpush3.bf16.msra.mxu1 %v2472_v13 }
 0x12c   :  { %2145 = vmatprep.subr.bf16.mxu1 %v2474_v15 }
 0x12f   :  { %2146 = vmatpush3.bf16.msra.mxu1 %v2474_v15 }
 0x1c5   :  { %v2089_v17 = vpop.f32.mrb[4].mxu1 }
 0x1c6   :  { %v329_v18 = vpop.f32.mrb[5].mxu1 }
 0x1c7   :  { %v348_v19 = vadd.f32 %v2089_v17, %v329_v18 }
 0x1c9   :  { %v2092_v20 = vpop.f32.mrb[6].mxu1 }
 0x1ca   :  { %v339_v21 = vpop.f32.mrb[7].mxu1 }
 0x1cb   :  { %v349_v22 = vadd.f32 %v348_v19, %v339_v21 }
 0x1cd   :  { %v350_v23 = vadd.f32 %v2092_v20, %v349_v22 }
 0x1cf   :  { %v351_v24 = vrot.slane %v350_v23, 4 }
 0x1d1   :  { %v352_v25 = vadd.f32 %v351_v24, %v350_v23 }
 0x1d3   :  { %v353_v29 = vrot.slane %v352_v25, 2 }
 0x1d5   :  { %v354_v35 = vadd.f32 %v353_v29, %v352_v25 }
 0x1d7   :  { %v355_v40 = vrot.slane %v354_v35, 1 }
 0x1d9   :  { %v356_v44 = vadd.f32 %v355_v40, %v354_v35  ;;  %v2476_v40 = vld [vmem:[%s3224_s7 + $0x40] sm:$0xff]  }
 0x1db   :  { %v357_v49 = vmul.f32 0.001953125, %v356_v44  ;;  %v145_v44 = vld [vmem:[%s3227_s12 + $0x10] sm:$0xff] }
 0x1dd   :  { %v457_v53 = vmul.f32 %v357_v49, %v357_v49 }
 0x1e5   :  { %v2127_v27 = vpop.f32.mrb[8].mxu1 }
 0x1e6   :  { %v428_v28 = vpop.f32.mrb[9].mxu1 }
 0x1e7   :  { %v447_v31 = vadd.f32 %v2127_v27, %v428_v28 }
 0x1e9   :  { %v2130_v32 = vpop.f32.mrb[10].mxu1 }
 0x1ea   :  { %v438_v34 = vpop.f32.mrb[11].mxu1 }
 0x1eb   :  { %v448_v37 = vadd.f32 %v447_v31, %v438_v34 }
 0x1ed   :  { %v449_v38 = vadd.f32 %v2130_v32, %v448_v37 }
 0x1ef   :  { %v450_v41 = vrot.slane %v449_v38, 4 }
 0x1f1   :  { %v451_v43 = vadd.f32 %v450_v41, %v449_v38  ;;  %v144_v41 = vld [vmem:[%s3227_s12 + $0x8] sm:$0xff] }
 0x1f3   :  { %v452_v46 = vrot.slane %v451_v43, 2 }
 0x1f5   :  { %v453_v47 = vadd.f32 %v452_v46, %v451_v43  ;;  %v148_v43 = vld [vmem:[%s3228_s13 + $0x8] sm:$0xff] }
 0x1f6   :  { %v2477_v46 = vld [vmem:[%s3224_s7 + $0x48] sm:$0xff]  }
 0x1f7   :  { %v454_v50 = vrot.slane %v453_v47, 1 }
 0x1f9   :  { %v455_v51 = vadd.f32 %v454_v50, %v453_v47  ;;  %v149_v47 = vld [vmem:[%s3228_s13 + $0x10] sm:$0xff]  ;;  %v150_v50 = vld [vmem:[%s3228_s13 + $0x18] sm:$0xff] }
 0x1fb   :  { %v456_v54 = vmul.f32 0.001953125, %v455_v51  ;;  %v2478_v51 = vld [vmem:[%s3224_s7 + $0x50] sm:$0xff]  }
 0x1fd   :  { %v458_v58 = vsub.f32 %v456_v54, %v457_v53  ;;  %v2479_v53 = vld [vmem:[%s3224_s7 + $0x58] sm:$0xff]   ;;  %v2480_v54 = vld [vmem:[%s3224_s7 + $0x60] sm:$0xff]  }
 0x1ff   :  { %v459_v59 = vmax.f32 %v458_v58, 0.0  ;;  %v2481_v58 = vld [vmem:[%s3224_s7 + $0x68] sm:$0xff]  }
 0x201   :  { %v460_v60 = vadd.f32 1e-05, %v459_v59  ;;  %v2482_v59 = vld [vmem:[%s3224_s7 + $0x70] sm:$0xff]  }
 0x203   :  { %2556 = vrsqrt.f32 %v460_v60  ;;  %v2483_v60 = vld [vmem:[%s3224_s7 + $0x78] sm:$0xff]  }
 0x20d   :  { %v2557_v1 = vpop.eup %2556 }
 0x20e   :  { %v462_v2 = vmul.f32 %v2557_v1, %v72_v63 }
 0x210   :  { %v463_v4 = vmul.f32 %v462_v2, %v357_v49  ;;  %v469_v5 = vrot.slane %v462_v2, %v2864_v0  ;;  %v146_v49 = vld [vmem:[%s3227_s12 + $0x18] sm:$0xff] }
 0x212   :  { %v464_v6 = vsub.f32 %v73_v3, %v463_v4  ;;  %v471_v7 = vmul.f32 %v469_v5, %v2775_v52  ;;  %v472_v8 = vmul.f32 %v469_v5, %v2777_v55  ;;  %v473_v13 = vmul.f32 %v469_v5, %v2780_v56  ;;  %v143_v52 = vld [vmem:[%s3227_s12] sm:$0xff] }
 0x213   :  { %v474_v14 = vmul.f32 %v469_v5, %v2785_v57  ;;  %v147_v55 = vld [vmem:[%s3228_s13] sm:$0xff] }
 0x214   :  { %v479_v12 = vrot.slane %v464_v6, %v2864_v0 }
 0x216   :  { %v481_v15 = vadd.f32 %v479_v12, %v471_v7  ;;  %v482_v16 = vadd.f32 %v479_v12, %v472_v8  ;;  %v483_v17 = vadd.f32 %v479_v12, %v473_v13  ;;  %v484_v18 = vadd.f32 %v479_v12, %v474_v14 }
 0x218   :  { %v485_v19 = vmax.f32 %v481_v15, 0.0  ;;  %v486_v20 = vmax.f32 %v482_v16, 0.0  ;;  %v487_v21 = vmax.f32 %v483_v17, 0.0  ;;  %v488_v22 = vmax.f32 %v484_v18, 0.0  ;;  %v2484_v18 = vld [vmem:[%s3229_s15] ss:$16 sps:$4 sm:$0xff]  }
 0x21a   :  { %v489_v23 = vpack.c.bf16 %v486_v20, %v485_v19  ;;  %v2875_v24 = vpack.c.bf16 %v488_v22, %v487_v21  ;;  %v2489_v21 = vld [vmem:[%s3229_s15 + $0x24] ss:$16 sps:$4 sm:$0xff]  }
 0x21c   :  { %2147 = vmatprep.mubr.bf16.mxu1 %v489_v23  ;;  %2167 = vmatprep.mubr.bf16.mxu0 %v489_v23 }
 0x21d   :  { %2148 = vmatmul.mubr.bf16.vlgmr.msra.gmra.mrb[12].mxu1 %v2875_v24  ;;  %2168 = vmatmul.mubr.bf16.vlgmr.msra.gmra.mrb[0].mxu0 %v2875_v24 }
 0x21e   :  { %2179 = vmatprep.mubr.msk.f32.mxu1 %vm685_vm1, %v143_v52  ;;  %2213 = vmatprep.mubr.msk.f32.mxu0 %vm685_vm1, %v147_v55  ;;  %v2487_v52 = vld [vmem:[%s3229_s15 + $0x20] ss:$16 sps:$4 sm:$0xff]  }
 0x2f0   :  { %v2149_v56 = vpop.f32.mrb[12].mxu1  ;;  %v2169_v57 = vpop.f32.mrb[0].mxu0 }
 0x2f1   :  { %v573_v25 = vpop.f32.mrb[13].mxu1  ;;  %v670_v27 = vpop.f32.mrb[1].mxu0 }
 0x2f2   :  { %v2150_v28 = vpop.f32.mrb[14].mxu1  ;;  %v2170_v29 = vpop.f32.mrb[2].mxu0 }
 0x2f3   :  { %v2363_v31 = vpack.c.bf16 %v2150_v28, %v2149_v56  ;;  %v2371_v32 = vpack.c.bf16 %v2170_v29, %v2169_v57  ;;  %v576_v34 = vpop.f32.mrb[15].mxu1  ;;  %v673_v35 = vpop.f32.mrb[3].mxu0  ;;  %v2492_v56 = vld [vmem:[%s3229_s15 + $0x44] ss:$16 sps:$4 sm:$0xff]   ;;  %v2490_v57 = vld [vmem:[%s3229_s15 + $0x40] ss:$16 sps:$4 sm:$0xff]  }
 0x2f4   :  { %v2359_v37 = vpack.c.bf16 %v576_v34, %v573_v25  ;;  %v2367_v38 = vpack.c.bf16 %v673_v35, %v670_v27  ;;  %v2495_v25 = vld [vmem:[%s3229_s15 + $0x64] ss:$16 sps:$4 sm:$0xff]   ;;  %v2493_v27 = vld [vmem:[%s3229_s15 + $0x60] ss:$16 sps:$4 sm:$0xff]   ;;  %v2498_v28 = vld [vmem:[%s3229_s15 + $0xc] ss:$16 sps:$4 sm:$0xff]  }
 0x2f5   :  { %v2496_v29 = vld [vmem:[%s3229_s15 + $0x8] ss:$16 sps:$4 sm:$0xff]   ;;  %v2504_v35 = vld [vmem:[%s3229_s15 + $0x4c] ss:$16 sps:$4 sm:$0xff]  }
 0x2f6   :  { %2360 = vmatprep.subr.bf16.mxu1 %v2359_v37  ;;  %2368 = vmatprep.subr.bf16.mxu0 %v2367_v38  ;;  %v2499_v34 = vld [vmem:[%s3229_s15 + $0x28] ss:$16 sps:$4 sm:$0xff]  }
 0x2f7   :  { %2362 = vmatpush3.bf16.msra.mxu1 %v2359_v37  ;;  %2370 = vmatpush3.bf16.msra.mxu0 %v2367_v38  ;;  %v2502_v37 = vld [vmem:[%s3229_s15 + $0x48] ss:$16 sps:$4 sm:$0xff]   ;;  %v1252_v38 = vpack.c.bf16 %v2682_v11, %v2677_v10  ;;  %v2510_v10 = vld [vmem:[%s3231_s14 + $0x4] ss:$16 sps:$4 sm:$0xff]   ;;  %v2508_v11 = vld [vmem:[%s3231_s14] ss:$16 sps:$4 sm:$0xff]  }
 0x2f8   :  { %2364 = vmatprep.subr.bf16.mxu1 %v2363_v31  ;;  %2372 = vmatprep.subr.bf16.mxu0 %v2371_v32 }
 0x2fb   :  { %2366 = vmatpush3.bf16.msra.mxu1 %v2363_v31  ;;  %2374 = vmatpush3.bf16.msra.mxu0 %v2371_v32  ;;  %v2560_v31 = vmov 0   ;;  %v2501_v32 = vld [vmem:[%s3229_s15 + $0x2c] ss:$16 sps:$4 sm:$0xff]  }
 0x2fc   :  { %2185 = vmatprep.subr.bf16.mxu1 %v2476_v40  ;;  %2376 = vmatprep.subr.bf16.mxu0 %v2695_v26 }
 0x2fe   :  { %2180 = vmatmul.mubr.msk.f32.vlgmr.msra.gmra.mrb[16].mxu1 %vm685_vm1, %v144_v41  ;;  %2214 = vmatmul.mubr.msk.f32.vlgmr.msra.gmra.mrb[4].mxu0 %vm685_vm1, %v148_v43  ;;  %v2505_v41 = vld [vmem:[%s3229_s15 + $0x68] ss:$16 sps:$4 sm:$0xff]   ;;  %v2513_v43 = vld [vmem:[%s3231_s14 + $0x24] ss:$16 sps:$4 sm:$0xff]  }
 0x2ff   :  { %2186 = vmatpush3.bf16.msra.mxu1 %v2476_v40  ;;  %2182 = vmatprep.mubr.msk.f32.mxu1 %vm685_vm1, %v145_v44  ;;  %v2507_v40 = vld [vmem:[%s3229_s15 + $0x6c] ss:$16 sps:$4 sm:$0xff]   ;;  %v2511_v44 = vld [vmem:[%s3231_s14 + $0x20] ss:$16 sps:$4 sm:$0xff]  }
 0x300   :  { %2187 = vmatprep.subr.bf16.mxu1 %v2477_v46  ;;  %2216 = vmatprep.mubr.msk.f32.mxu0 %vm685_vm1, %v149_v47  ;;  %v2519_v47 = vld [vmem:[%s3231_s14 + $0x64] ss:$16 sps:$4 sm:$0xff]  }
 0x301   :  { %2378 = vmatpush3.bf16.msra.mxu0 %v2695_v26 }
 0x302   :  { %2183 = vmatmul.mubr.msk.f32.gmra.mrb[18].mxu1 %vm685_vm1, %v146_v49  ;;  %2217 = vmatmul.mubr.msk.f32.gmra.mrb[6].mxu0 %vm685_vm1, %v150_v50  ;;  %v2517_v49 = vld [vmem:[%s3231_s14 + $0x60] ss:$16 sps:$4 sm:$0xff]   ;;  %v2522_v50 = vld [vmem:[%s3231_s14 + $0x84] ss:$16 sps:$4 sm:$0xff]  }
 0x303   :  { %2188 = vmatpush3.bf16.msra.mxu1 %v2477_v46  ;;  %2201 = vmatprep.mubr.bf16.mxu1 %v489_v23  ;;  %v2516_v46 = vld [vmem:[%s3231_s14 + $0x44] ss:$16 sps:$4 sm:$0xff]  }
 0x304   :  { %2189 = vmatprep.subr.bf16.mxu1 %v2478_v51  ;;  %2380 = vmatprep.subr.bf16.mxu0 %v2705_v30 }
 0x305   :  { %2382 = vmatpush3.bf16.msra.mxu0 %v2705_v30 }
 0x306   :  { %2384 = vmatprep.subr.bf16.mxu0 %v2716_v33 }
 0x307   :  { %2190 = vmatpush3.bf16.msra.mxu1 %v2478_v51  ;;  %v2520_v51 = vld [vmem:[%s3231_s14 + $0x80] ss:$16 sps:$4 sm:$0xff]  }
 0x308   :  { %2191 = vmatprep.subr.bf16.mxu1 %v2479_v53 }
 0x309   :  { %2386 = vmatpush3.bf16.msra.mxu0 %v2716_v33 }
 0x30a   :  { %2388 = vmatprep.subr.bf16.mxu0 %v2726_v36 }
 0x30b   :  { %2192 = vmatpush3.bf16.msra.mxu1 %v2479_v53  ;;  %v2525_v53 = vld [vmem:[%s3231_s14 + $0xa4] ss:$16 sps:$4 sm:$0xff]  }
 0x30c   :  { %2193 = vmatprep.subr.bf16.mxu1 %v2480_v54 }
 0x30d   :  { %2390 = vmatpush3.bf16.msra.mxu0 %v2726_v36 }
 0x30e   :  { %2392 = vmatprep.subr.bf16.mxu0 %v2736_v39 }
 0x30f   :  { %2194 = vmatpush3.bf16.msra.mxu1 %v2480_v54  ;;  %v2523_v54 = vld [vmem:[%s3231_s14 + $0xa0] ss:$16 sps:$4 sm:$0xff]  }
 0x310   :  { %2195 = vmatprep.subr.bf16.mxu1 %v2481_v58 }
 0x311   :  { %2394 = vmatpush3.bf16.msra.mxu0 %v2736_v39 }
 0x312   :  { %2396 = vmatprep.subr.bf16.mxu0 %v2746_v42 }
 0x313   :  { %2196 = vmatpush3.bf16.msra.mxu1 %v2481_v58  ;;  %v2528_v58 = vld [vmem:[%s3231_s14 + $0xc4] ss:$16 sps:$4 sm:$0xff]  }
 0x314   :  { %2197 = vmatprep.subr.bf16.mxu1 %v2482_v59 }
 0x315   :  { %2398 = vmatpush3.bf16.msra.mxu0 %v2746_v42 }
 0x316   :  { %2400 = vmatprep.subr.bf16.mxu0 %v2756_v45 }
 0x317   :  { %2198 = vmatpush3.bf16.msra.mxu1 %v2482_v59  ;;  %v2526_v59 = vld [vmem:[%s3231_s14 + $0xc0] ss:$16 sps:$4 sm:$0xff]  }
 0x318   :  { %2199 = vmatprep.subr.bf16.mxu1 %v2483_v60 }
 0x319   :  { %2402 = vmatpush3.bf16.msra.mxu0 %v2756_v45 }
 0x31a   :  { %2404 = vmatprep.subr.bf16.mxu0 %v2767_v48 }
 0x31b   :  { %2200 = vmatpush3.bf16.msra.mxu1 %v2483_v60  ;;  %v2531_v60 = vld [vmem:[%s3231_s14 + $0xe4] ss:$16 sps:$4 sm:$0xff]  }
 0x31c   :  { %2408 = vmatprep.subr.bf16.mxu1 %v2695_v26 }
 0x31d   :  { %2406 = vmatpush3.bf16.msra.mxu0 %v2767_v48 }
 0x31e   :  { %2202 = vmatmul.mubr.bf16.vlgmr.msra.gmra.mrb[20].mxu1 %v2875_v24 }
 0x31f   :  { %2410 = vmatpush3.bf16.msra.mxu1 %v2695_v26  ;;  %v2486_v26 = vld [vmem:[%s3229_s15 + $0x4] ss:$16 sps:$4 sm:$0xff]  }
 0x320   :  { %2412 = vmatprep.subr.bf16.mxu1 %v2705_v30  ;;  %1355 = vmatprep.subr.bf16.mxu0 %v2486_v26  ;;  %v2529_v26 = vld [vmem:[%s3231_s14 + $0xe0] ss:$16 sps:$4 sm:$0xff]  }
 0x323   :  { %2414 = vmatpush3.bf16.msra.mxu1 %v2705_v30 }
 0x324   :  { %2416 = vmatprep.subr.bf16.mxu1 %v2716_v33 }
 0x327   :  { %2418 = vmatpush3.bf16.msra.mxu1 %v2716_v33 }
 0x328   :  { %2420 = vmatprep.subr.bf16.mxu1 %v2726_v36 }
 0x32b   :  { %2422 = vmatpush3.bf16.msra.mxu1 %v2726_v36 }
 0x32c   :  { %2424 = vmatprep.subr.bf16.mxu1 %v2736_v39 }
 0x32f   :  { %2426 = vmatpush3.bf16.msra.mxu1 %v2736_v39 }
 0x330   :  { %2428 = vmatprep.subr.bf16.mxu1 %v2746_v42 }
 0x333   :  { %2430 = vmatpush3.bf16.msra.mxu1 %v2746_v42 }
 0x334   :  { %2432 = vmatprep.subr.bf16.mxu1 %v2756_v45 }
 0x337   :  { %2434 = vmatpush3.bf16.msra.mxu1 %v2756_v45 }
 0x338   :  { %2436 = vmatprep.subr.bf16.mxu1 %v2767_v48 }
 0x33b   :  { %2438 = vmatpush3.bf16.msra.mxu1 %v2767_v48  ;;  %v1858_v48 = vld [vmem:[%s3230_s8] ss:$0 sm:$0xff] }
 0x3d1   :  { %v2181_v30 = vpop.f32.mrb[16].mxu1  ;;  %v2215_v33 = vpop.f32.mrb[4].mxu0 }
 0x3d2   :  { %v764_v36 = vpop.f32.mrb[17].mxu1  ;;  %v958_v39 = vpop.f32.mrb[5].mxu0 }
 0x3d5   :  { %v2184_v61 = vpop.f32.mrb[18].mxu1  ;;  %v2218_v63 = vpop.f32.mrb[6].mxu0 }
 0x3d6   :  { %v774_v42 = vpop.f32.mrb[19].mxu1  ;;  %v968_v1 = vpop.f32.mrb[7].mxu0 }
 0x3f1   :  { %v2203_v2 = vpop.f32.mrb[20].mxu1 }
 0x3f2   :  { %v874_v3 = vadd.f32 %v2203_v2, %v774_v42  ;;  %v865_v45 = vpop.f32.mrb[21].mxu1 }
 0x3f3   :  { %v866_v4 = vadd.f32 %v865_v45, %v764_v36  ;;  %v2204_v5 = vpop.f32.mrb[22].mxu1 }
 0x3f4   :  { %v877_v6 = vadd.f32 %v2204_v5, %v2184_v61  ;;  %v979_v7 = vadd.f32 %v968_v1, %v874_v3  ;;  %v868_v8 = vpop.f32.mrb[23].mxu1 }
 0x3f5   :  { %v977_v12 = vadd.f32 %v958_v39, %v866_v4  ;;  %v869_v13 = vadd.f32 %v2181_v30, %v868_v8  ;;  %v2534_v30 = vld [vmem:[%s3231_s14 + $0xc] ss:$16 sps:$4 sm:$0xff]  }
 0x3f6   :  { %v980_v14 = vadd.f32 %v2218_v63, %v877_v6  ;;  %v2976_v17 = vadd.f32 %v1858_v48, %v979_v7 }
 0x3f7   :  { %v978_v15 = vadd.f32 %v2215_v33, %v869_v13  ;;  %v2974_v16 = vadd.f32 %v1858_v48, %v977_v12 }
 0x3f8   :  { %v2992_v23 = vadd.f32 %v1858_v48, %v980_v14  ;;  %v1088_v24 = vmul.f32 %v2976_v17, %v2976_v17 }
 0x3f9   :  { %v2981_v19 = vadd.f32 %v1858_v48, %v978_v15  ;;  %2251 = vmatprep.mubr.f32.mxu0 %v2974_v16  ;;  %v1086_v20 = vmul.f32 %v2974_v16, %v2974_v16 }
 0x3fa   :  { %v1089_v55 = vmul.f32 %v2992_v23, %v2992_v23 }
 0x3fb   :  { %2252 = vmatmul.mubr.f32.vlgmr.msra.gmra.mrb[8].mxu0 %v2981_v19  ;;  %2289 = vmatprep.mubr.f32.mxu1 %v1086_v20  ;;  %v1087_v22 = vmul.f32 %v2981_v19, %v2981_v19 }
 0x3fc   :  { %2254 = vmatprep.mubr.f32.mxu0 %v2976_v17  ;;  %1356 = vmatpush1.bf16.msra.mxu0 %v2484_v18 }
 0x3fd   :  { %2290 = vmatmul.mubr.f32.vlgmr.msra.gmra.mrb[24].mxu1 %v1087_v22  ;;  %1357 = vmatprep.subr.bf16.mxu0 %v2489_v21 }
 0x3fe   :  { %2292 = vmatprep.mubr.f32.mxu1 %v1088_v24 }
 0x3ff   :  { %2255 = vmatmul.mubr.f32.gmra.mrb[10].mxu0 %v2992_v23 }
 0x400   :  { %1358 = vmatpush1.bf16.msra.mxu0 %v2487_v52  ;;  %1387 = vmatprep.mubr.bf16.mxu0 %v2560_v31 }
 0x401   :  { %2293 = vmatmul.mubr.f32.gmra.mrb[26].mxu1 %v1089_v55  ;;  %1359 = vmatprep.subr.bf16.mxu0 %v2492_v56 }
 0x404   :  { %1360 = vmatpush1.bf16.msra.mxu0 %v2490_v57 }
 0x405   :  { %1361 = vmatprep.subr.bf16.mxu0 %v2495_v25 }
 0x408   :  { %1362 = vmatpush1.bf16.msra.mxu0 %v2493_v27 }
 0x409   :  { %1408 = vmatprep.subr.bf16.mxu0 %v2498_v28 }
 0x40b   :  { %1875 = vmatmul.mubr.msk.bf16.vlgmr.msra.gmra.mrb[12].mxu0 %vm207_vm0, %v2672_v9 }
 0x40c   :  { %1409 = vmatpush1.bf16.msra.mxu0 %v2496_v29  ;;  %1397 = vmatprep.mubr.bf16.mxu0 %v2560_v31  ;;  %v125_v29 = vld [vmem:[%s3232_s9] sm:$0x1] }
 0x40d   :  { %1410 = vmatprep.subr.bf16.mxu0 %v2501_v32 }
 0x410   :  { %1411 = vmatpush1.bf16.msra.mxu0 %v2499_v34 }
 0x411   :  { %1412 = vmatprep.subr.bf16.mxu0 %v2504_v35  ;;  %v126_v35 = vld [vmem:[%s3233_s10] sm:$0x1] }
 0x413   :  { %1876 = vmatmul.mubr.msk.bf16.gmra.mrb[16].mxu0 %vm207_vm0, %v1252_v38 }
 0x414   :  { %1413 = vmatpush1.bf16.msra.mxu0 %v2502_v37  ;;  %1440 = vmatprep.mubr.bf16.mxu0 %v2560_v31 }
 0x415   :  { %1414 = vmatprep.subr.bf16.mxu0 %v2507_v40 }
 0x418   :  { %1415 = vmatpush1.bf16.msra.mxu0 %v2505_v41 }
 0x419   :  { %1621 = vmatprep.subr.bf16.mxu0 %v2510_v10 }
 0x41b   :  { %1877 = vmatmul.mubr.msk.bf16.vlgmr.msra.gmra.mrb[20].mxu0 %vm207_vm0, %v2672_v9  ;;  %v2514_v9 = vld [vmem:[%s3231_s14 + $0x40] ss:$16 sps:$4 sm:$0xff]  }
 0x41c   :  { %1622 = vmatpush1.bf16.msra.mxu0 %v2508_v11  ;;  %1450 = vmatprep.mubr.bf16.mxu0 %v2560_v31 }
 0x41d   :  { %1623 = vmatprep.subr.bf16.mxu0 %v2513_v43 }
 0x420   :  { %1624 = vmatpush1.bf16.msra.mxu0 %v2511_v44 }
 0x421   :  { %1625 = vmatprep.subr.bf16.mxu0 %v2516_v46 }
 0x423   :  { %1878 = vmatmul.mubr.msk.bf16.gmra.mrb[24].mxu0 %vm207_vm0, %v1252_v38 }
 0x424   :  { %1626 = vmatpush1.bf16.msra.mxu0 %v2514_v9  ;;  %1653 = vmatprep.mubr.bf16.mxu0 %v2560_v31 }
 0x425   :  { %1627 = vmatprep.subr.bf16.mxu0 %v2519_v47 }
 0x428   :  { %1628 = vmatpush1.bf16.msra.mxu0 %v2517_v49 }
 0x429   :  { %1629 = vmatprep.subr.bf16.mxu0 %v2522_v50 }
 0x42c   :  { %1630 = vmatpush1.bf16.msra.mxu0 %v2520_v51 }
 0x42d   :  { %1631 = vmatprep.subr.bf16.mxu0 %v2525_v53 }
 0x430   :  { %1632 = vmatpush1.bf16.msra.mxu0 %v2523_v54 }
 0x431   :  { %1633 = vmatprep.subr.bf16.mxu0 %v2528_v58 }
 0x434   :  { %1634 = vmatpush1.bf16.msra.mxu0 %v2526_v59  ;;  %v2540_v59 = vld [vmem:[%s3231_s14 + $0x4c] ss:$16 sps:$4 sm:$0xff]  }
 0x435   :  { %1635 = vmatprep.subr.bf16.mxu0 %v2531_v60  ;;  %v2538_v60 = vld [vmem:[%s3231_s14 + $0x48] ss:$16 sps:$4 sm:$0xff]  }
 0x438   :  { %1636 = vmatpush1.bf16.msra.mxu0 %v2529_v26  ;;  %v2543_v26 = vld [vmem:[%s3231_s14 + $0x6c] ss:$16 sps:$4 sm:$0xff]  }
 0x439   :  { %1674 = vmatprep.subr.bf16.mxu0 %v2534_v30  ;;  %v2541_v30 = vld [vmem:[%s3231_s14 + $0x68] ss:$16 sps:$4 sm:$0xff]  }
 0x4ce   :  { %v2253_v33 = vpop.f32.mrb[8].mxu0 }
 0x4cf   :  { %v1057_v36 = vpop.f32.mrb[9].mxu0 }
 0x4d0   :  { %v1076_v39 = vadd.f32 %v2253_v33, %v1057_v36  ;;  %v2291_v61 = vpop.f32.mrb[24].mxu1  ;;  %v2546_v33 = vld [vmem:[%s3231_s14 + $0x8c] ss:$16 sps:$4 sm:$0xff]   ;;  %v2544_v36 = vld [vmem:[%s3231_s14 + $0x88] ss:$16 sps:$4 sm:$0xff]  }
 0x4d1   :  { %v1156_v63 = vpop.f32.mrb[25].mxu1 }
 0x4d2   :  { %v1175_v42 = vadd.f32 %v2291_v61, %v1156_v63  ;;  %v2256_v1 = vpop.f32.mrb[10].mxu0  ;;  %v2547_v61 = vld [vmem:[%s3231_s14 + $0xa8] ss:$16 sps:$4 sm:$0xff]   ;;  %v2552_v63 = vld [vmem:[%s3231_s14 + $0xcc] ss:$16 sps:$4 sm:$0xff]  }
 0x4d3   :  { %v1067_v2 = vpop.f32.mrb[11].mxu0 }
 0x4d4   :  { %v1077_v3 = vadd.f32 %v1076_v39, %v1067_v2  ;;  %v2294_v45 = vpop.f32.mrb[26].mxu1  ;;  %v2549_v39 = vld [vmem:[%s3231_s14 + $0xac] ss:$16 sps:$4 sm:$0xff]   ;;  %v2553_v2 = vld [vmem:[%s3231_s14 + $0xe8] ss:$16 sps:$4 sm:$0xff]  }
 0x4d5   :  { %v1166_v4 = vpop.f32.mrb[27].mxu1 }
 0x4d6   :  { %v1078_v5 = vadd.f32 %v2256_v1, %v1077_v3  ;;  %v1176_v6 = vadd.f32 %v1175_v42, %v1166_v4  ;;  %v2550_v42 = vld [vmem:[%s3231_s14 + $0xc8] ss:$16 sps:$4 sm:$0xff]   ;;  %v2555_v1 = vld [vmem:[%s3231_s14 + $0xec] ss:$16 sps:$4 sm:$0xff]   ;;  %v1727_v3 = vld [vmem:[%s3234_s16] sm:$0xf] }
 0x4d7   :  { %v1732_v4 = vrot.slane %v1727_v3, %v2864_v0 }
 0x4d8   :  { %v1079_v48 = vrot.slane %v1078_v5, 4  ;;  %v1177_v7 = vadd.f32 %v2294_v45, %v1176_v6  ;;  %v1735_v45 = vsub.s32 1, %v2858_v62 }
 0x4da   :  { %v1080_v8 = vadd.f32 %v1079_v48, %v1078_v5  ;;  %v1178_v12 = vrot.slane %v1177_v7, 4  ;;  %v1736_v5 = vrot.slane %v1727_v3, %v1735_v45 }
 0x4dc   :  { %v1081_v13 = vrot.slane %v1080_v8, 2  ;;  %v1179_v14 = vadd.f32 %v1178_v12, %v1177_v7 }
 0x4de   :  { %v1082_v15 = vadd.f32 %v1081_v13, %v1080_v8  ;;  %v1180_v18 = vrot.slane %v1179_v14, 2 }
 0x4e0   :  { %v1083_v20 = vrot.slane %v1082_v15, 1  ;;  %v1181_v21 = vadd.f32 %v1180_v18, %v1179_v14 }
 0x4e2   :  { %v1084_v22 = vadd.f32 %v1083_v20, %v1082_v15  ;;  %v1182_v24 = vrot.slane %v1181_v21, 1 }
 0x4e4   :  { %v1085_v52 = vmul.f32 0.001953125, %v1084_v22  ;;  %v1183_v55 = vadd.f32 %v1182_v24, %v1181_v21 }
 0x4e6   :  { %v1185_v56 = vmul.f32 %v1085_v52, %v1085_v52  ;;  %v1184_v57 = vmul.f32 0.001953125, %v1183_v55  ;;  %v1739_v55 = vsub.s32 2, %v2858_v62 }
 0x4e8   :  { %v1186_v25 = vsub.f32 %v1184_v57, %v1185_v56  ;;  %v1743_v56 = vsub.s32 3, %v2858_v62  ;;  %v1740_v57 = vrot.slane %v1727_v3, %v1739_v55 }
 0x4ea   :  { %v1187_v27 = vmax.f32 %v1186_v25, 0.0  ;;  %v1744_v25 = vrot.slane %v1727_v3, %v1743_v56 }
 0x4ec   :  { %v1188_v28 = vadd.f32 1e-05, %v1187_v27 }
 0x4ee   :  { %2558 = vrsqrt.f32 %v1188_v28 }
 0x4f8   :  { %v2559_v32 = vpop.eup %2558 }
 0x4f9   :  { %v1190_v34 = vmul.f32 %v2559_v32, %v125_v29 }
 0x4fb   :  { %v1191_v37 = vmul.f32 %v1190_v34, %v1085_v52  ;;  %v1197_v38 = vrot.slane %v1190_v34, %v2864_v0 }
 0x4fd   :  { %v1192_v40 = vsub.f32 %v126_v35, %v1191_v37  ;;  %v1199_v41 = vmul.f32 %v1197_v38, %v2974_v16  ;;  %v1200_v10 = vmul.f32 %v1197_v38, %v2981_v19  ;;  %v1201_v43 = vmul.f32 %v1197_v38, %v2976_v17  ;;  %v2532_v16 = vld [vmem:[%s3231_s14 + $0x8] ss:$16 sps:$4 sm:$0xff]   ;;  %v2537_v19 = vld [vmem:[%s3231_s14 + $0x2c] ss:$16 sps:$4 sm:$0xff]  }
 0x4fe   :  { %v1202_v44 = vmul.f32 %v1197_v38, %v2992_v23  ;;  %v2535_v23 = vld [vmem:[%s3231_s14 + $0x28] ss:$16 sps:$4 sm:$0xff]  }
 0x4ff   :  { %v1207_v11 = vrot.slane %v1192_v40, %v2864_v0 }
 0x501   :  { %v1209_v46 = vadd.f32 %v1207_v11, %v1199_v41  ;;  %v1210_v9 = vadd.f32 %v1207_v11, %v1200_v10  ;;  %v1211_v47 = vadd.f32 %v1207_v11, %v1201_v43  ;;  %v1212_v49 = vadd.f32 %v1207_v11, %v1202_v44 }
 0x503   :  { %v1213_v50 = vmax.f32 %v1209_v46, 0.0  ;;  %v1214_v51 = vmax.f32 %v1210_v9, 0.0  ;;  %v1215_v53 = vmax.f32 %v1211_v47, 0.0  ;;  %v1216_v54 = vmax.f32 %v1212_v49, 0.0 }
 0x505   :  { %v1217_v58 = vpack.c.bf16 %v1214_v51, %v1213_v50  ;;  %v1218_v17 = vpack.c.bf16 %v1216_v54, %v1215_v53 }
 0x507   :  { %1654 = vmatmul.mubr.bf16.vlgmr.msra.gmra.mrb[12].mxu0 %v1217_v58 }
 0x508   :  { %1675 = vmatpush1.bf16.msra.mxu0 %v2532_v16  ;;  %1663 = vmatprep.mubr.bf16.mxu0 %v2560_v31 }
 0x509   :  { %1676 = vmatprep.subr.bf16.mxu0 %v2537_v19 }
 0x50c   :  { %1677 = vmatpush1.bf16.msra.mxu0 %v2535_v23 }
 0x50d   :  { %1678 = vmatprep.subr.bf16.mxu0 %v2540_v59 }
 0x50f   :  { %1664 = vmatmul.mubr.bf16.gmra.mrb[16].mxu0 %v1218_v17 }
 0x510   :  { %1679 = vmatpush1.bf16.msra.mxu0 %v2538_v60  ;;  %1706 = vmatprep.mubr.bf16.mxu0 %v2560_v31 }
 0x511   :  { %1680 = vmatprep.subr.bf16.mxu0 %v2543_v26 }
 0x514   :  { %1681 = vmatpush1.bf16.msra.mxu0 %v2541_v30 }
 0x515   :  { %1682 = vmatprep.subr.bf16.mxu0 %v2546_v33 }
 0x518   :  { %1683 = vmatpush1.bf16.msra.mxu0 %v2544_v36 }
 0x519   :  { %1684 = vmatprep.subr.bf16.mxu0 %v2549_v39 }
 0x51c   :  { %1685 = vmatpush1.bf16.msra.mxu0 %v2547_v61 }
 0x51d   :  { %1686 = vmatprep.subr.bf16.mxu0 %v2552_v63 }
 0x520   :  { %1687 = vmatpush1.bf16.msra.mxu0 %v2550_v42 }
 0x521   :  { %1688 = vmatprep.subr.bf16.mxu0 %v2555_v1 }
 0x524   :  { %1689 = vmatpush1.bf16.msra.mxu0 %v2553_v2 }
 0x527   :  { %1707 = vmatmul.mubr.bf16.vlgmr.msra.gmra.mrb[20].mxu0 %v1217_v58 }
 0x528   :  { %1716 = vmatprep.mubr.bf16.mxu0 %v2560_v31 }
 0x52f   :  { %1717 = vmatmul.mubr.bf16.gmra.mrb[24].mxu0 %v1218_v17 }
 0x5da   :  { %v1655_v6 = vpop.f32.mrb[12].mxu0 }
 0x5db   :  { %v1749_v48 = vadd.f32 %v1732_v4, %v1655_v6  ;;  %v1657_v7 = vpop.f32.mrb[13].mxu0 }
 0x5dc   :  { %v1750_v8 = vadd.f32 %v1736_v5, %v1657_v7  ;;  %v1659_v12 = vpop.f32.mrb[14].mxu0 }
 0x5dd   :  { %1765 = vst [vmem:[%s3235_s17] sm:$0xff] %v1749_v48  ;;  %v1753_v31 = vadd.f32 %v1732_v4, %v1659_v12  ;;  %v1661_v13 = vpop.f32.mrb[15].mxu0 }
 0x5de   :  { %1766 = vst [vmem:[%s3235_s17 + $0x8] sm:$0xff] %v1750_v8  ;;  %v1754_v14 = vadd.f32 %v1736_v5, %v1661_v13 }
 0x5df   :  { %1769 = vst [vmem:[%s3235_s17 + $0x20] sm:$0xff] %v1753_v31 }
 0x5e0   :  { %1770 = vst [vmem:[%s3235_s17 + $0x28] sm:$0xff] %v1754_v14 }
 0x5e2   :  { %v1665_v0 = vpop.f32.mrb[16].mxu0 }
 0x5e3   :  { %v1757_v15 = vadd.f32 %v1732_v4, %v1665_v0  ;;  %v1667_v18 = vpop.f32.mrb[17].mxu0 }
 0x5e4   :  { %v1758_v20 = vadd.f32 %v1736_v5, %v1667_v18  ;;  %v1669_v21 = vpop.f32.mrb[18].mxu0 }
 0x5e5   :  { %1773 = vst [vmem:[%s3235_s17 + $0x40] sm:$0xff] %v1757_v15  ;;  %v1761_v22 = vadd.f32 %v1732_v4, %v1669_v21  ;;  %v1671_v24 = vpop.f32.mrb[19].mxu0 }
 0x5e6   :  { %1774 = vst [vmem:[%s3235_s17 + $0x48] sm:$0xff] %v1758_v20  ;;  %v1762_v52 = vadd.f32 %v1736_v5, %v1671_v24 }
 0x5e7   :  { %1777 = vst [vmem:[%s3235_s17 + $0x60] sm:$0xff] %v1761_v22 }
 0x5e8   :  { %1778 = vst [vmem:[%s3235_s17 + $0x68] sm:$0xff] %v1762_v52 }
 0x5fa   :  { %v1708_v27 = vpop.f32.mrb[20].mxu0 }
 0x5fb   :  { %v1751_v28 = vadd.f32 %v1740_v57, %v1708_v27  ;;  %v1710_v29 = vpop.f32.mrb[21].mxu0 }
 0x5fc   :  { %v1752_v32 = vadd.f32 %v1744_v25, %v1710_v29  ;;  %v1712_v34 = vpop.f32.mrb[22].mxu0 }
 0x5fd   :  { %1767 = vst [vmem:[%s3235_s17 + $0x10] sm:$0xff] %v1751_v28  ;;  %v1755_v35 = vadd.f32 %v1740_v57, %v1712_v34  ;;  %v1714_v37 = vpop.f32.mrb[23].mxu0 }
 0x5fe   :  { %1768 = vst [vmem:[%s3235_s17 + $0x18] sm:$0xff] %v1752_v32  ;;  %v1756_v38 = vadd.f32 %v1744_v25, %v1714_v37 }
 0x5ff   :  { %1771 = vst [vmem:[%s3235_s17 + $0x30] sm:$0xff] %v1755_v35 }
 0x600   :  { %1772 = vst [vmem:[%s3235_s17 + $0x38] sm:$0xff] %v1756_v38 }
 0x602   :  { %v1718_v62 = vpop.f32.mrb[24].mxu0 }
 0x603   :  { %v1759_v40 = vadd.f32 %v1740_v57, %v1718_v62  ;;  %v1720_v41 = vpop.f32.mrb[25].mxu0 }
 0x604   :  { %v1760_v10 = vadd.f32 %v1744_v25, %v1720_v41  ;;  %v1722_v11 = vpop.f32.mrb[26].mxu0 }
 0x605   :  { %1775 = vst [vmem:[%s3235_s17 + $0x50] sm:$0xff] %v1759_v40  ;;  %v1763_v43 = vadd.f32 %v1740_v57, %v1722_v11  ;;  %v1724_v44 = vpop.f32.mrb[27].mxu0 }
 0x606   :  { %1776 = vst [vmem:[%s3235_s17 + $0x58] sm:$0xff] %v1760_v10  ;;  %v1764_v46 = vadd.f32 %v1744_v25, %v1724_v44 }
 0x607   :  { %1779 = vst [vmem:[%s3235_s17 + $0x70] sm:$0xff] %v1763_v43 }
 0x608   :  { %1780 = vst [vmem:[%s3235_s17 + $0x78] sm:$0xff] %v1764_v46 }

</bundles_post_ra>
